<compile_context>
chip_gen: v6e
topology: v6e:2x2x1
jax: 0.10.0
libtpu: 0.0.40
codegen_flags: <defaults>
</compile_context>

<pallas_src>
import jax
import jax.numpy as jnp
from jax.experimental import pallas as pl
from jax.experimental.pallas import tpu as pltpu


# ----------------------------------------------------------------------------
# Kernel
# ----------------------------------------------------------------------------
def cognitive_emotional_kernel(
    x_ref,
    w_emb_ref, b_emb_ref,      # BatchNorm folded in
    w_cat_ref, b_cat_ref,      # [head Linear-1 | GRU W_ih]; attention + b_hh(r,z) folded in
    w2_ref, b2_ref,            # zero-padded to a 128-wide hidden layer
    w3_ref, b3_ref,            # padded to a 128-wide probs slab (-1e9 pad bias)
    b_hhn_ref,                 # b_hh n-slice (gated by r, cannot fold)
    probs_ref, reg_ref, raw_ref,
):
    # ---- emotional_embedding: (Linear + folded BatchNorm) -> LeakyReLU(0.2)
    x = x_ref[...].astype(jnp.bfloat16)            # f32 HBM read, cast on VPU
    h = jnp.dot(x, w_emb_ref[...], preferred_element_type=jnp.float32)
    h = h + b_emb_ref[...]
    emotional_f32 = jnp.where(h > 0, h, 0.2 * h)   # f32
    emotional = emotional_f32.astype(jnp.bfloat16)
    raw_ref[...] = emotional                       # bf16 output, reuse the cast

    # ---- cognitive_attention (seq_len == 1): fully folded into w_cat offline.

    # ---- single wide matmul: [head Linear-1 | GRU input projection]
    H1 = w2_ref.shape[0]                           # 128
    D = reg_ref.shape[-1]
    hcat = jnp.dot(emotional, w_cat_ref[...], preferred_element_type=jnp.float32)
    hcat = hcat + b_cat_ref[...]                   # (Bt, 128 + 3D)

    # ---- emotion_inference: ReLU -> Dropout(id) -> Linear -> ReLU -> Linear -> softmax
    h1 = jnp.maximum(hcat[:, :H1], 0.0).astype(jnp.bfloat16)
    h2 = jnp.dot(h1, w2_ref[...], preferred_element_type=jnp.float32) + b2_ref[...]
    h2 = jnp.maximum(h2, 0.0).astype(jnp.bfloat16)
    logits = jnp.dot(h2, w3_ref[...], preferred_element_type=jnp.float32)
    logits = logits + b3_ref[...]                  # padded cols: -1e9
    m = jnp.max(logits, axis=-1, keepdims=True)
    e = jnp.exp(logits - m)                        # padded cols -> exactly 0
    probs_ref[...] = (e / jnp.sum(e, axis=-1, keepdims=True)).astype(probs_ref.dtype)

    # ---- emotional_regulation: GRUCell with h0 = 0  ->  h' = (1 - z) * n
    gi = hcat[:, H1:]                              # (Bt, 3D), 128-aligned slices
    r = jax.nn.sigmoid(gi[:, :D])
    z = jax.nn.sigmoid(gi[:, D:2 * D])
    n = jnp.tanh(gi[:, 2 * D:3 * D] + r * b_hhn_ref[...])
    reg_ref[...] = ((1.0 - z) * n).astype(reg_ref.dtype)


# ----------------------------------------------------------------------------
# Offline parameter preparation (constant folding + fusion + lane padding)
# ----------------------------------------------------------------------------
def _round_up(n, m):
    return ((n + m - 1) // m) * m


def prepare_params(p, eps=1e-5, neg_bias=-1e9):
    f = jnp.float32
    D = p["w_emb"].shape[1]

    # 1) Fold eval-mode BatchNorm1d into the embedding Linear.
    scale = p["bn_gamma"].astype(f) * jax.lax.rsqrt(p["bn_var"].astype(f) + eps)
    w_emb = p["w_emb"].astype(f) * scale
    b_emb = (p["b_emb"].astype(f) - p["bn_mean"].astype(f)) * scale + p["bn_beta"].astype(f)

    # 2) seq_len == 1 MultiheadAttention == out_proj(v_proj(.)).
    W_vo = p["wv"].astype(f) @ p["wo"].astype(f)
    b_vo = p["bv"].astype(f) @ p["wo"].astype(f) + p["bo"].astype(f)

    # 3) Fold the fused attention projection into its two consumers.
    w1 = W_vo @ p["w1"].astype(f)
    b1 = b_vo @ p["w1"].astype(f) + p["b1"].astype(f)
    w_ih = W_vo @ p["w_ih"].astype(f)
    b_ih = b_vo @ p["w_ih"].astype(f) + p["b_ih"].astype(f)

    # 4) GRUCell with h0 == 0: fold b_hh r/z slices into b_ih, keep the n-slice.
    b_ih = b_ih.at[:, :2 * D].add(p["b_hh"][:, :2 * D].astype(f))
    b_hh_n = p["b_hh"][:, 2 * D:3 * D].astype(f)

    # 5) Fuse head Linear-1 and the GRU input projection into one matmul.
    w_cat = jnp.concatenate([w1, w_ih], axis=1)        # (D, 128 + 3D)
    b_cat = jnp.concatenate([b1, b_ih], axis=1)        # (1, 128 + 3D)

    # 6) Pad the rest of the inference head to lane-dense (mult-of-128) widths.
    w2, b2 = p["w2"].astype(f), p["b2"].astype(f)
    w3, b3 = p["w3"].astype(f), p["b3"].astype(f)
    H2, C = w2.shape[1], w3.shape[1]
    H2p, Cp = _round_up(H2, 128), _round_up(C, 128)
    w2 = jnp.pad(w2, ((0, 0), (0, H2p - H2)))
    b2 = jnp.pad(b2, ((0, 0), (0, H2p - H2)))
    w3 = jnp.pad(w3, ((0, H2p - H2), (0, Cp - C)))
    b3 = jnp.pad(b3, ((0, 0), (0, Cp - C)), constant_values=neg_bias)

    bf16 = jnp.bfloat16
    return {
        # matmul weights in bf16 (f32 MXU accumulation in-kernel), biases in f32
        "w_emb": w_emb.astype(bf16), "b_emb": b_emb,
        "w_cat": w_cat.astype(bf16), "b_cat": b_cat,
        "w2": w2.astype(bf16), "b2": b2,
        "w3": w3.astype(bf16), "b3": b3,
        "b_hh_n": b_hh_n,
        "num_classes": C,
        "latent_dim": D,
    }


# ----------------------------------------------------------------------------
# Wrapper: batch-tiled pallas_call
# ----------------------------------------------------------------------------
def _choose_tile_b(batch, tile_b_max):
    """Batch tile <= tile_b_max, multiple of 8, >= 2 tiles when batch allows
    (keeps both v7x TensorCores busy), dividing batch when cheaply possible
    (avoids a wrapper-side pad copy of x)."""
    cap = max(8, min(tile_b_max, _round_up(batch, 8)))
    cap -= cap % 8
    if batch >= 16:
        cap = min(cap, max(8, _round_up(pl.cdiv(batch, 2), 8)))
    if batch % 8 == 0:
        t = cap
        while t >= max(128, cap // 2):
            if batch % t == 0:
                return t
            t -= 8
    return cap


def cognitive_emotional_encoder(x, prep, tile_b=512):
    # tile_b is an upper bound: 512 is a good default on v6e/v7x (weights <1 MiB,
    # per-tile buffers a few MiB); 256 keeps v5e comfortably under its 16 MiB
    # default scoped-VMEM limit.
    B, IN = x.shape
    D = prep["latent_dim"]
    C = prep["num_classes"]
    Cp = prep["w3"].shape[1]

    assert IN % 128 == 0 and D % 128 == 0, \
        "input_dim and latent_dim must be multiples of 128 for lane-dense tiles"
    # TODO(synk): generalize to non-multiple-of-128 feature dims by padding here.

    tile_b = _choose_tile_b(B, tile_b)
    n_tiles = pl.cdiv(B, tile_b)
    B_pad = n_tiles * tile_b
    x_in = x if B_pad == B else jnp.pad(x, ((0, B_pad - B), (0, 0)))

    weight_names = ("w_emb", "b_emb", "w_cat", "b_cat", "w2", "b2",
                    "w3", "b3", "b_hh_n")
    weights = tuple(prep[nm] for nm in weight_names)

    def const_spec(shape):
        # Constant block index -> VMEM-resident across all batch tiles.
        # TODO(synk): pipeline_mode=pl.Buffered(1) would drop the duplicated
        # weight buffer; skipped, the saving is <1 MiB at these sizes.
        return pl.BlockSpec(shape, lambda i: (0,) * len(shape))

    in_specs = [pl.BlockSpec((tile_b, IN), lambda i: (i, 0))]
    in_specs += [const_spec(w.shape) for w in weights]

    out_shape = (
        jax.ShapeDtypeStruct((B_pad, Cp), jnp.bfloat16),   # padded probs slab
        jax.ShapeDtypeStruct((B_pad, D), jnp.bfloat16),    # regulated_features
        jax.ShapeDtypeStruct((B_pad, D), jnp.bfloat16),    # raw_emotional_features
    )
    out_specs = (
        pl.BlockSpec((tile_b, Cp), lambda i: (i, 0)),
        pl.BlockSpec((tile_b, D), lambda i: (i, 0)),
        pl.BlockSpec((tile_b, D), lambda i: (i, 0)),
    )

    # Rough per-tile VMEM footprint: only raise the scoped limit when the
    # estimate exceeds the smallest default (16 MiB on v5e); cap well under
    # v7x's 64 MiB physical VMEM.
    w_bytes = sum(int(w.size) * w.dtype.itemsize for w in weights)
    ccat = prep["w_cat"].shape[1]
    est = (2 * tile_b * IN * x.dtype.itemsize        # x tiles (double-buffered)
           + 2 * tile_b * (Cp + 2 * D) * 2           # bf16 output tiles (double-buffered)
           + 2 * w_bytes                             # weights (worst case)
           + tile_b * (2 * D + ccat + Cp) * 4)       # f32 intermediates
    vmem_limit = (min(int(est * 1.25), 48 * 1024 * 1024)
                  if est > 14 * 1024 * 1024 else None)

    probs_pad, reg, raw = pl.pallas_call(
        cognitive_emotional_kernel,
        out_shape=out_shape,
        grid=(n_tiles,),
        in_specs=in_specs,
        out_specs=out_specs,
        compiler_params=pltpu.CompilerParams(
            dimension_semantics=("parallel",),       # megacore sharding on v7x
            vmem_limit_bytes=vmem_limit),
    )(x_in, *weights)

    return {
        "emotion_probabilities": probs_pad[:B, :C].astype(jnp.float32),
        "regulated_features": reg[:B],
        "raw_emotional_features": raw[:B],
    }


# ----------------------------------------------------------------------------
# Parameter init (PyTorch-layout, pre-transposed to (in, out)) and a pure-JAX
# f32 reference of the original (un-folded) eval-mode forward pass.
# ----------------------------------------------------------------------------
def init_params(key, input_dim, latent_dim):
    ks = jax.random.split(key, 16)
    nrm = lambda k, s, scale=0.05: (scale * jax.random.normal(k, s)).astype(jnp.float32)
    return {
        # emotional_embedding
        "w_emb": nrm(ks[0], (input_dim, latent_dim)),
        "b_emb": nrm(ks[1], (1, latent_dim)),
        "bn_gamma": 1.0 + nrm(ks[2], (1, latent_dim)),
        "bn_beta": nrm(ks[3], (1, latent_dim)),
        "bn_mean": nrm(ks[4], (1, latent_dim)),
        "bn_var": 1.0 + jnp.abs(nrm(ks[5], (1, latent_dim))),
        # cognitive_attention (only V and out_proj survive seq_len == 1)
        "wv": nrm(ks[6], (latent_dim, latent_dim)),
        "bv": nrm(ks[7], (1, latent_dim)),
        "wo": nrm(ks[8], (latent_dim, latent_dim)),
        "bo": nrm(ks[9], (1, latent_dim)),
        # emotion_inference head
        "w1": nrm(ks[10], (latent_dim, 128)),
        "b1": nrm(ks[11], (1, 128)),
        "w2": nrm(ks[12], (128, 64)),
        "b2": nrm(ks[13], (1, 64)),
        "w3": nrm(ks[14], (64, 5)),
        "b3": nrm(ks[15], (1, 5)),
        # emotional_regulation GRUCell (gate order r, z, n; (in, 3*hidden))
        "w_ih": nrm(jax.random.fold_in(key, 100), (latent_dim, 3 * latent_dim)),
        "b_ih": nrm(jax.random.fold_in(key, 101), (1, 3 * latent_dim)),
        "b_hh": nrm(jax.random.fold_in(key, 102), (1, 3 * latent_dim)),
        # TODO(synk): weight_hh (3D, D) is unused because h0 == 0 in this forward pass.
    }


def reference_forward(x, p, eps=1e-5):
    h = x @ p["w_emb"] + p["b_emb"]
    h = (h - p["bn_mean"]) / jnp.sqrt(p["bn_var"] + eps)
    h = h * p["bn_gamma"] + p["bn_beta"]
    emotional = jnp.where(h > 0, h, 0.2 * h)
    v = emotional @ p["wv"] + p["bv"]
    attended = v @ p["wo"] + p["bo"]
    h1 = jnp.maximum(attended @ p["w1"] + p["b1"], 0.0)
    h2 = jnp.maximum(h1 @ p["w2"] + p["b2"], 0.0)
    probs = jax.nn.softmax(h2 @ p["w3"] + p["b3"], axis=-1)
    D = p["w_emb"].shape[1]
    gi = attended @ p["w_ih"] + p["b_ih"]
    gh = p["b_hh"]
    r = jax.nn.sigmoid(gi[:, :D] + gh[:, :D])
    z = jax.nn.sigmoid(gi[:, D:2 * D] + gh[:, D:2 * D])
    n = jnp.tanh(gi[:, 2 * D:] + r * gh[:, 2 * D:])
    return probs, (1.0 - z) * n, emotional


if __name__ == "__main__":
    INPUT_DIM = 256    # small, lane-aligned stand-in for the default 768
    LATENT_DIM = 128   # small, lane-aligned stand-in for the default 256
    BATCH = 256        # exercises 2 pipelined / megacore-parallel batch tiles

    key = jax.random.PRNGKey(0)
    k_x, k_p = jax.random.split(key)
    x = jax.random.normal(k_x, (BATCH, INPUT_DIM), dtype=jnp.float32)
    raw_params = init_params(k_p, INPUT_DIM, LATENT_DIM)
    prep = prepare_params(raw_params)

    out = cognitive_emotional_encoder(x, prep)
    jax.block_until_ready(out)

    assert out["emotion_probabilities"].shape == (BATCH, 5)
    assert out["regulated_features"].shape == (BATCH, LATENT_DIM)
    assert out["raw_emotional_features"].shape == (BATCH, LATENT_DIM)
    # softmax rows sum to ~1 (exact divide, bf16 storage rounding only)
    assert jnp.allclose(out["emotion_probabilities"].sum(-1), 1.0, atol=1e-2)

    # cross-check against the un-folded f32 reference (bf16 weights/activations
    # and bf16 outputs in the kernel -> loose tolerances)
    ref_probs, ref_reg, ref_raw = reference_forward(x, raw_params)
    assert jnp.allclose(out["emotion_probabilities"], ref_probs, atol=3e-2)
    assert jnp.allclose(out["regulated_features"].astype(jnp.float32), ref_reg, atol=5e-2)
    assert jnp.allclose(out["raw_emotional_features"].astype(jnp.float32), ref_raw, atol=5e-2)

    print("KERNEL_OK")
</pallas_src>

<mosaic_0001>
module attributes {stable_mosaic.version = 11 : i64} {
  func.func @cognitive_emotional_kernel(%arg0: i32, %arg1: memref<128x256xf32, #tpu.memory_space<vmem>>, %arg2: memref<256x128xbf16, #tpu.memory_space<vmem>>, %arg3: memref<1x128xf32, #tpu.memory_space<vmem>>, %arg4: memref<128x512xbf16, #tpu.memory_space<vmem>>, %arg5: memref<1x512xf32, #tpu.memory_space<vmem>>, %arg6: memref<128x128xbf16, #tpu.memory_space<vmem>>, %arg7: memref<1x128xf32, #tpu.memory_space<vmem>>, %arg8: memref<128x128xbf16, #tpu.memory_space<vmem>>, %arg9: memref<1x128xf32, #tpu.memory_space<vmem>>, %arg10: memref<1x128xf32, #tpu.memory_space<vmem>>, %arg11: memref<128x128xbf16, #tpu.memory_space<vmem>>, %arg12: memref<128x128xbf16, #tpu.memory_space<vmem>>, %arg13: memref<128x128xbf16, #tpu.memory_space<vmem>>) attributes {dimension_semantics = [#tpu.dimension_semantics<parallel>], iteration_bounds = array<i64: 2>, scalar_prefetch = 0 : i64, scratch_operands = 0 : i64, tpu.core_type = #tpu.core_type<tc>, window_params = [{transform_indices = @transform_0, window_bounds = array<i64: 128, 256>}, {pipeline_mode = #tpu.pipeline_mode<synchronous>, transform_indices = @transform_1, window_bounds = array<i64: 256, 128>}, {pipeline_mode = #tpu.pipeline_mode<synchronous>, transform_indices = @transform_2, window_bounds = array<i64: 1, 128>}, {pipeline_mode = #tpu.pipeline_mode<synchronous>, transform_indices = @transform_3, window_bounds = array<i64: 128, 512>}, {pipeline_mode = #tpu.pipeline_mode<synchronous>, transform_indices = @transform_4, window_bounds = array<i64: 1, 512>}, {pipeline_mode = #tpu.pipeline_mode<synchronous>, transform_indices = @transform_5, window_bounds = array<i64: 128, 128>}, {pipeline_mode = #tpu.pipeline_mode<synchronous>, transform_indices = @transform_6, window_bounds = array<i64: 1, 128>}, {pipeline_mode = #tpu.pipeline_mode<synchronous>, transform_indices = @transform_7, window_bounds = array<i64: 128, 128>}, {pipeline_mode = #tpu.pipeline_mode<synchronous>, transform_indices = @transform_8, window_bounds = array<i64: 1, 128>}, {pipeline_mode = #tpu.pipeline_mode<synchronous>, transform_indices = @transform_9, window_bounds = array<i64: 1, 128>}, {transform_indices = @transform_10, window_bounds = array<i64: 128, 128>}, {transform_indices = @transform_11, window_bounds = array<i64: 128, 128>}, {transform_indices = @transform_12, window_bounds = array<i64: 128, 128>}]} {
    %c0 = arith.constant 0 : index
    %c0_0 = arith.constant 0 : index
    %0 = vector.load %arg1[%c0, %c0_0] : memref<128x256xf32, #tpu.memory_space<vmem>>, vector<128x256xf32>
    %1 = arith.truncf %0 : vector<128x256xf32> to vector<128x256xbf16>
    %c0_1 = arith.constant 0 : index
    %c0_2 = arith.constant 0 : index
    %2 = vector.load %arg2[%c0_1, %c0_2] : memref<256x128xbf16, #tpu.memory_space<vmem>>, vector<256x128xbf16>
    %cst = arith.constant dense<0.000000e+00> : vector<128x128xf32>
    %3 = tpu.matmul %1, %2, %cst {dimension_numbers = #tpu.dot_dimension_numbers<[1], [0], [0], [1], [0, 0, 1, 1], [], []>} : vector<128x256xbf16>, vector<256x128xbf16>, vector<128x128xf32> -> vector<128x128xf32>
    %c0_3 = arith.constant 0 : index
    %c0_4 = arith.constant 0 : index
    %4 = vector.load %arg3[%c0_3, %c0_4] : memref<1x128xf32, #tpu.memory_space<vmem>>, vector<1x128xf32>
    %5 = vector.broadcast %4 : vector<1x128xf32> to vector<128x128xf32>
    %6 = arith.addf %3, %5 : vector<128x128xf32>
    %cst_5 = arith.constant 0.000000e+00 : f32
    %7 = vector.broadcast %cst_5 : f32 to vector<128x128xf32>
    %8 = arith.cmpf ogt, %6, %7 : vector<128x128xf32>
    %cst_6 = arith.constant 2.000000e-01 : f32
    %9 = vector.broadcast %cst_6 : f32 to vector<128x128xf32>
    %10 = arith.mulf %9, %6 : vector<128x128xf32>
    %11 = arith.select %8, %6, %10 : vector<128x128xi1>, vector<128x128xf32>
    %12 = arith.truncf %11 : vector<128x128xf32> to vector<128x128xbf16>
    %c0_7 = arith.constant 0 : index
    %c0_8 = arith.constant 0 : index
    %13 = vector.load %arg13[%c0_7, %c0_8] : memref<128x128xbf16, #tpu.memory_space<vmem>>, vector<128x128xbf16>
    tpu.vector_store %arg13[%c0_7, %c0_8], %12 {strides = array<i32>} : memref<128x128xbf16, #tpu.memory_space<vmem>>, vector<128x128xbf16>,
    %c0_9 = arith.constant 0 : index
    %c0_10 = arith.constant 0 : index
    %14 = vector.load %arg4[%c0_9, %c0_10] : memref<128x512xbf16, #tpu.memory_space<vmem>>, vector<128x512xbf16>
    %cst_11 = arith.constant dense<0.000000e+00> : vector<128x512xf32>
    %15 = tpu.matmul %12, %14, %cst_11 {dimension_numbers = #tpu.dot_dimension_numbers<[1], [0], [0], [1], [0, 0, 1, 1], [], []>} : vector<128x128xbf16>, vector<128x512xbf16>, vector<128x512xf32> -> vector<128x512xf32>
    %c0_12 = arith.constant 0 : index
    %c0_13 = arith.constant 0 : index
    %16 = vector.load %arg5[%c0_12, %c0_13] : memref<1x512xf32, #tpu.memory_space<vmem>>, vector<1x512xf32>
    %17 = vector.broadcast %16 : vector<1x512xf32> to vector<128x512xf32>
    %18 = arith.addf %15, %17 : vector<128x512xf32>
    %19 = vector.extract_strided_slice %18 {offsets = [0, 0], sizes = [128, 128], strides = [1, 1]} : vector<128x512xf32> to vector<128x128xf32>
    %cst_14 = arith.constant 0.000000e+00 : f32
    %20 = vector.broadcast %cst_14 : f32 to vector<128x128xf32>
    %21 = arith.maximumf %19, %20 : vector<128x128xf32>
    %22 = arith.truncf %21 : vector<128x128xf32> to vector<128x128xbf16>
    %c0_15 = arith.constant 0 : index
    %c0_16 = arith.constant 0 : index
    %23 = vector.load %arg6[%c0_15, %c0_16] : memref<128x128xbf16, #tpu.memory_space<vmem>>, vector<128x128xbf16>
    %cst_17 = arith.constant dense<0.000000e+00> : vector<128x128xf32>
    %24 = tpu.matmul %22, %23, %cst_17 {dimension_numbers = #tpu.dot_dimension_numbers<[1], [0], [0], [1], [0, 0, 1, 1], [], []>} : vector<128x128xbf16>, vector<128x128xbf16>, vector<128x128xf32> -> vector<128x128xf32>
    %c0_18 = arith.constant 0 : index
    %c0_19 = arith.constant 0 : index
    %25 = vector.load %arg7[%c0_18, %c0_19] : memref<1x128xf32, #tpu.memory_space<vmem>>, vector<1x128xf32>
    %26 = vector.broadcast %25 : vector<1x128xf32> to vector<128x128xf32>
    %27 = arith.addf %24, %26 : vector<128x128xf32>
    %cst_20 = arith.constant 0.000000e+00 : f32
    %28 = vector.broadcast %cst_20 : f32 to vector<128x128xf32>
    %29 = arith.maximumf %27, %28 : vector<128x128xf32>
    %30 = arith.truncf %29 : vector<128x128xf32> to vector<128x128xbf16>
    %c0_21 = arith.constant 0 : index
    %c0_22 = arith.constant 0 : index
    %31 = vector.load %arg8[%c0_21, %c0_22] : memref<128x128xbf16, #tpu.memory_space<vmem>>, vector<128x128xbf16>
    %cst_23 = arith.constant dense<0.000000e+00> : vector<128x128xf32>
    %32 = tpu.matmul %30, %31, %cst_23 {dimension_numbers = #tpu.dot_dimension_numbers<[1], [0], [0], [1], [0, 0, 1, 1], [], []>} : vector<128x128xbf16>, vector<128x128xbf16>, vector<128x128xf32> -> vector<128x128xf32>
    %c0_24 = arith.constant 0 : index
    %c0_25 = arith.constant 0 : index
    %33 = vector.load %arg9[%c0_24, %c0_25] : memref<1x128xf32, #tpu.memory_space<vmem>>, vector<1x128xf32>
    %34 = vector.broadcast %33 : vector<1x128xf32> to vector<128x128xf32>
    %35 = arith.addf %32, %34 : vector<128x128xf32>
    %cst_26 = arith.constant dense<0xFF800000> : vector<128xf32>
    %36 = vector.multi_reduction <maximumf>, %35, %cst_26 [1] : vector<128x128xf32> to vector<128xf32>
    %37 = vector.shape_cast %36 : vector<128xf32> to vector<128x1xf32>
    %38 = vector.broadcast %37 : vector<128x1xf32> to vector<128x128xf32>
    %39 = arith.subf %35, %38 : vector<128x128xf32>
    %40 = math.exp %39 : vector<128x128xf32>
    %cst_27 = arith.constant dense<0.000000e+00> : vector<128xf32>
    %41 = vector.multi_reduction <add>, %40, %cst_27 [1] : vector<128x128xf32> to vector<128xf32>
    %42 = vector.shape_cast %41 : vector<128xf32> to vector<128x1xf32>
    %43 = vector.broadcast %42 : vector<128x1xf32> to vector<128x128xf32>
    %44 = arith.divf %40, %43 : vector<128x128xf32>
    %45 = arith.truncf %44 : vector<128x128xf32> to vector<128x128xbf16>
    %c0_28 = arith.constant 0 : index
    %c0_29 = arith.constant 0 : index
    %46 = vector.load %arg11[%c0_28, %c0_29] : memref<128x128xbf16, #tpu.memory_space<vmem>>, vector<128x128xbf16>
    tpu.vector_store %arg11[%c0_28, %c0_29], %45 {strides = array<i32>} : memref<128x128xbf16, #tpu.memory_space<vmem>>, vector<128x128xbf16>,
    %47 = vector.extract_strided_slice %18 {offsets = [0, 128], sizes = [128, 384], strides = [1, 1]} : vector<128x512xf32> to vector<128x384xf32>
    %48 = vector.extract_strided_slice %47 {offsets = [0, 0], sizes = [128, 128], strides = [1, 1]} : vector<128x384xf32> to vector<128x128xf32>
    %49 = arith.negf %48 : vector<128x128xf32>
    %50 = math.exp %49 : vector<128x128xf32>
    %cst_30 = arith.constant 1.000000e+00 : f32
    %51 = vector.broadcast %cst_30 : f32 to vector<128x128xf32>
    %52 = arith.addf %51, %50 : vector<128x128xf32>
    %53 = arith.divf %51, %52 : vector<128x128xf32>
    %54 = vector.extract_strided_slice %47 {offsets = [0, 128], sizes = [128, 128], strides = [1, 1]} : vector<128x384xf32> to vector<128x128xf32>
    %55 = arith.negf %54 : vector<128x128xf32>
    %56 = math.exp %55 : vector<128x128xf32>
    %cst_31 = arith.constant 1.000000e+00 : f32
    %57 = vector.broadcast %cst_31 : f32 to vector<128x128xf32>
    %58 = arith.addf %57, %56 : vector<128x128xf32>
    %59 = arith.divf %57, %58 : vector<128x128xf32>
    %60 = vector.extract_strided_slice %47 {offsets = [0, 256], sizes = [128, 128], strides = [1, 1]} : vector<128x384xf32> to vector<128x128xf32>
    %c0_32 = arith.constant 0 : index
    %c0_33 = arith.constant 0 : index
    %61 = vector.load %arg10[%c0_32, %c0_33] : memref<1x128xf32, #tpu.memory_space<vmem>>, vector<1x128xf32>
    %62 = vector.broadcast %61 : vector<1x128xf32> to vector<128x128xf32>
    %63 = arith.mulf %53, %62 : vector<128x128xf32>
    %64 = arith.addf %60, %63 : vector<128x128xf32>
    %65 = math.tanh %64 : vector<128x128xf32>
    %cst_34 = arith.constant 1.000000e+00 : f32
    %66 = vector.broadcast %cst_34 : f32 to vector<128x128xf32>
    %67 = arith.subf %66, %59 : vector<128x128xf32>
    %68 = arith.mulf %67, %65 : vector<128x128xf32>
    %69 = arith.truncf %68 : vector<128x128xf32> to vector<128x128xbf16>
    %c0_35 = arith.constant 0 : index
    %c0_36 = arith.constant 0 : index
    %70 = vector.load %arg12[%c0_35, %c0_36] : memref<128x128xbf16, #tpu.memory_space<vmem>>, vector<128x128xbf16>
    tpu.vector_store %arg12[%c0_35, %c0_36], %69 {strides = array<i32>} : memref<128x128xbf16, #tpu.memory_space<vmem>>, vector<128x128xbf16>,
    return
  }
  func.func @transform_0(%arg0: i32) -> (i32, i32) {
    %c0_i32 = arith.constant 0 : i32
    %c0_i32_0 = arith.constant 0 : i32
    return %arg0, %c0_i32 : i32, i32
  }
  func.func @transform_1(%arg0: i32) -> (i32, i32) {
    %c0_i32 = arith.constant 0 : i32
    %c0_i32_0 = arith.constant 0 : i32
    %c0_i32_1 = arith.constant 0 : i32
    return %c0_i32, %c0_i32_0 : i32, i32
  }
  func.func @transform_2(%arg0: i32) -> (i32, i32) {
    %c0_i32 = arith.constant 0 : i32
    %c0_i32_0 = arith.constant 0 : i32
    %c0_i32_1 = arith.constant 0 : i32
    return %c0_i32, %c0_i32_0 : i32, i32
  }
  func.func @transform_3(%arg0: i32) -> (i32, i32) {
    %c0_i32 = arith.constant 0 : i32
    %c0_i32_0 = arith.constant 0 : i32
    %c0_i32_1 = arith.constant 0 : i32
    return %c0_i32, %c0_i32_0 : i32, i32
  }
  func.func @transform_4(%arg0: i32) -> (i32, i32) {
    %c0_i32 = arith.constant 0 : i32
    %c0_i32_0 = arith.constant 0 : i32
    %c0_i32_1 = arith.constant 0 : i32
    return %c0_i32, %c0_i32_0 : i32, i32
  }
  func.func @transform_5(%arg0: i32) -> (i32, i32) {
    %c0_i32 = arith.constant 0 : i32
    %c0_i32_0 = arith.constant 0 : i32
    %c0_i32_1 = arith.constant 0 : i32
    return %c0_i32, %c0_i32_0 : i32, i32
  }
  func.func @transform_6(%arg0: i32) -> (i32, i32) {
    %c0_i32 = arith.constant 0 : i32
    %c0_i32_0 = arith.constant 0 : i32
    %c0_i32_1 = arith.constant 0 : i32
    return %c0_i32, %c0_i32_0 : i32, i32
  }
  func.func @transform_7(%arg0: i32) -> (i32, i32) {
    %c0_i32 = arith.constant 0 : i32
    %c0_i32_0 = arith.constant 0 : i32
    %c0_i32_1 = arith.constant 0 : i32
    return %c0_i32, %c0_i32_0 : i32, i32
  }
  func.func @transform_8(%arg0: i32) -> (i32, i32) {
    %c0_i32 = arith.constant 0 : i32
    %c0_i32_0 = arith.constant 0 : i32
    %c0_i32_1 = arith.constant 0 : i32
    return %c0_i32, %c0_i32_0 : i32, i32
  }
  func.func @transform_9(%arg0: i32) -> (i32, i32) {
    %c0_i32 = arith.constant 0 : i32
    %c0_i32_0 = arith.constant 0 : i32
    %c0_i32_1 = arith.constant 0 : i32
    return %c0_i32, %c0_i32_0 : i32, i32
  }
  func.func @transform_10(%arg0: i32) -> (i32, i32) {
    %c0_i32 = arith.constant 0 : i32
    %c0_i32_0 = arith.constant 0 : i32
    return %arg0, %c0_i32 : i32, i32
  }
  func.func @transform_11(%arg0: i32) -> (i32, i32) {
    %c0_i32 = arith.constant 0 : i32
    %c0_i32_0 = arith.constant 0 : i32
    return %arg0, %c0_i32 : i32, i32
  }
  func.func @transform_12(%arg0: i32) -> (i32, i32) {
    %c0_i32 = arith.constant 0 : i32
    %c0_i32_0 = arith.constant 0 : i32
    return %arg0, %c0_i32 : i32, i32
  }
}

</mosaic_0001>

<bundles_post_ra>
// kernel: tpu_custom_call.1
= control target key start
LH: loop header
LB: loop body
LE: loop exit
PB: predicated region body
PF: predicated region fallthrough
CT: control target
= control target key end

     0   :  { %s4534_s0 = inlined_call_operand.hbm [shape: f32[256,256], index: 0, kind: input, shape index: {}]   ;;  %s4535_s1 = inlined_call_operand.hbm [shape: bf16[256,128], index: 1, kind: input, shape index: {}]   ;;  %s4536_s2 = inlined_call_operand.vmem [shape: f32[1,128], index: 2, kind: input, shape index: {}]   ;;  %s4537_s3 = inlined_call_operand.hbm [shape: bf16[128,512], index: 3, kind: input, shape index: {}]   ;;  %s4538_s4 = inlined_call_operand.vmem [shape: f32[1,512], index: 4, kind: input, shape index: {}]   ;;  %s4539_s5 = inlined_call_operand.hbm [shape: bf16[128,128], index: 5, kind: input, shape index: {}]   ;;  %s4540_s6 = inlined_call_operand.vmem [shape: f32[1,128], index: 6, kind: input, shape index: {}]   ;;  %s4541_s7 = inlined_call_operand.hbm [shape: bf16[128,128], index: 7, kind: input, shape index: {}]   ;;  %s4542_s8 = inlined_call_operand.vmem [shape: f32[1,128], index: 8, kind: input, shape index: {}]   ;;  %s4543_s9 = inlined_call_operand.vmem [shape: f32[1,128], index: 9, kind: input, shape index: {}]   ;;  %s4544_s10 = inlined_call_operand.hbm [shape: bf16[256,128], index: 10, kind: output, shape index: {0}]   ;;  %s4545_s11 = inlined_call_operand.hbm [shape: bf16[256,128], index: 11, kind: output, shape index: {1}]   ;;  %s4546_s12 = inlined_call_operand.hbm [shape: bf16[256,128], index: 12, kind: output, shape index: {2}]  }
   0x1   :  { %4556 = sst [smem:[#allocation22_spill]] %s4534_s0 }
   0x2   :  { %4557 = sst [smem:[#allocation23_spill]] %s4535_s1 }
   0x3   :  { %4558 = sst [smem:[#allocation24_spill]] %s4537_s3 }
   0x4   :  { %4559 = sst [smem:[#allocation25_spill]] %s4539_s5 }
   0x5   :  { %4560 = sst [smem:[#allocation26_spill]] %s4541_s7 }
   0x6   :  { %18 = vsyncpa [#allocation3], 0 }
   0x7   :  { %20 = vsyncpa [#allocation3 + $0x1], 0 }
   0x8   :  { %21 = vsyncpa [#allocation6], 0 }
   0x9   :  { %22 = vsyncpa [#allocation9], 0 }
   0xa   :  { %23 = vsyncpa [#allocation4], 0 }
   0xb   :  { %25 = vsyncpa [#allocation4 + $0x1], 0 }
   0xc   :  { %26 = vsyncpa [#allocation13], 0 }
   0xd   :  { %28 = vsyncpa [#allocation13 + $0x1], 0  ;;  %s3840_s21 = smov 0   ;;  %s3842_s22 = smov 0  }
   0xe   :  { %s3844_s23 = smov 0   ;;  %s3846_s24 = smov 0  }
   0xf LB: > { %s3861_s25 = sadd.s32 4294967295, %s3758_s24   ;;  %s4547_s26 = sadd.s32 4294967294, %s3758_s24   ;;  %s3758_s24 = sphi %s3846_s24, %s4592_s24   ;;  %s3754_s23 = sphi %s3844_s23, %s4591_s23   ;;  %s3750_s22 = sphi %s3842_s22, %s4590_s22   ;;  %s3746_s21 = sphi %s3840_s21, %s4589_s21  }
  0x10   : > { %p54_p0 = scmp.ne.s32.totalorder %s3750_s22, %s3746_s21  ;;  %p4549_p1 = scmp.eq.s32.totalorder %s3861_s25, 0 }
  0x11   : > { %p267_p2 = scmp.eq.s32.totalorder %s3861_s25, 1  ;;  %p273_p3 = scmp.eq.s32.totalorder %s4547_s26, 1 }
  0x12   : > { %p3872_p4 = por %p4549_p1, %p54_p0  ;;  %p2558_p5 = scmp.ge.s32.totalorder %s3758_s24, 1 }
  0x13   : > { %p3877_p6 = por %p273_p3, %p54_p0  ;;  %p332_p7 = scmp.lt.s32.totalorder %s3758_s24, 3 }
  0x14   : > { %s4561_s27 = scalar_select %p3872_p4, 1, 0 }
  0x15   : > { %s4562_s28 = scalar_select %p3877_p6, 1, 0 }
  0x16   : > { %p3882_p8 = pnand %p2558_p5, %p332_p7  ;;  %s3760_s30 = smov [#allocation5]  }
  0x17   : > { %4563 = sst [smem:[#allocation20_spill]] %s4562_s28  ;;  %s344_s13 = sshll.u32 %s3760_s30, 4  ;;  %s345_s13 = int_to_ptr.vmem [resolvable:$true] %s344_s13 }
  0x18   : > { %s4564_s29 = scalar_select %p3882_p8, 1, 0 }
  0x19   : > { %p3114_p9 = pneg %p3882_p8  ;;  %s3761_s15 = smov [#allocation8]  }
  0x1a   : > { %s376_s16 = sshll.u32 %s3761_s15, 4  ;;  %s3762_s17 = smov [#allocation7]   ;;  %s377_s16 = int_to_ptr.vmem [resolvable:$true] %s376_s16 }
  0x1b   : > { %p3891_p11 = pnand %p3114_p9, %p4549_p1  ;;  %s360_s18 = sshll.u32 %s3762_s17, 4  ;;  %s361_s18 = int_to_ptr.vmem [resolvable:$true] %s360_s18 }
  0x1c   : > { %s3509_s19 = scalar_lea.vmem %s345_s13, 2048  ;;  %p3517_p5 = scmp.lt.s32.totalorder %s345_s13, %s345_s13 }
  0x1d   : > { %p3500_p12 = pneg %p3891_p11  ;;  %p3510_p13 = scmp.ne.s32.totalorder %s345_s13, %s3509_s19 }
  0x1e   : > { %p3518_p7 = scmp.lt.s32.totalorder %s3509_s19, %s3509_s19 }
  0x1f   : > { %p3512_p0 = pnand %p3510_p13, %p3500_p12 }
  0x20   : > { %p3519_p9 = por %p3518_p7, %p3517_p5 }
  0x21   : > { %p3513_p3 = pneg %p3512_p0 }
  0x23   : > { %p3520_p10 = pnand %p3519_p9, %p3513_p3 }
  0x25   : > { %3523 = shalt.err (!%p3520_p10)
}
  0x26   : > { %s4550_s20 = smov 64   ;;  %s3764_s30 = smov 4  }
  0x27   : > { %s4566_s1 = sld [smem:[#allocation23_spill]]  ;;  %s3535_s26 = scalar_lea.vmem %s377_s16, 1024 }
  0x28   : > { %p3536_p13 = scmp.ne.s32.totalorder %s377_s16, %s3535_s26  ;;  %p3543_p3 = scmp.lt.s32.totalorder %s377_s16, %s377_s16 }
  0x29   : > { %p3544_p10 = scmp.lt.s32.totalorder %s3535_s26, %s3535_s26 }
  0x2a   : > { %p3538_p0 = pnand %p3536_p13, %p3500_p12 }
  0x2b   : > { %p3545_p7 = por %p3544_p10, %p3543_p3 }
  0x2c   : > { %p3539_p5 = pneg %p3538_p0 }
  0x2d   : > { %3117 = dma.hbm_to_vmem [thread:$0]  (!%p3891_p11), %s4566_s1, 2048, %s345_s13, [#allocation6], %s4550_s20, %s4550_s20, %s3764_s30  }
  0x2e   : > { %p3546_p9 = pnand %p3545_p7, %p3539_p5 }
  0x30   : > { %3549 = shalt.err (!%p3546_p9)
}
  0x31   : > { %s4567_s5 = sld [smem:[#allocation25_spill]]  ;;  %s3561_s13 = scalar_lea.vmem %s361_s18, 4096 }
  0x32   : > { %p3562_p1 = scmp.ne.s32.totalorder %s361_s18, %s3561_s13  ;;  %p3569_p3 = scmp.lt.s32.totalorder %s361_s18, %s361_s18 }
  0x33   : > { %p3570_p5 = scmp.lt.s32.totalorder %s3561_s13, %s3561_s13 }
  0x34   : > { %p3564_p13 = pnand %p3562_p1, %p3500_p12 }
  0x35   : > { %p3571_p10 = por %p3570_p5, %p3569_p3 }
  0x36   : > { %p3565_p0 = pneg %p3564_p13 }
  0x37   : > { %3123 = dma.hbm_to_vmem [thread:$0]  (!%p3891_p11), %s4567_s5, 1024, %s377_s16, [#allocation9], %s4550_s20, %s4550_s20, %s3764_s30  }
  0x38   : > { %p3572_p7 = pnand %p3571_p10, %p3565_p0 }
  0x3a   : > { %3575 = shalt.err (!%p3572_p7)
}
  0x3b   : > { %s4551_s26 = smov 256   ;;  %s4552_s15 = smov 16  }
  0x3c   : > { %s4568_s3 = sld [smem:[#allocation24_spill]]  ;;  %s3767_s17 = smov [#allocation10]  }
  0x3d   : > { %s392_s19 = sshll.u32 %s3767_s17, 4  ;;  %s393_s19 = int_to_ptr.vmem [resolvable:$true] %s392_s19 }
  0x3e   : > { %s3587_s20 = scalar_lea.vmem %s393_s19, 1024  ;;  %p3595_p0 = scmp.lt.s32.totalorder %s393_s19, %s393_s19 }
  0x3f   : > { %p3588_p1 = scmp.ne.s32.totalorder %s393_s19, %s3587_s20  ;;  %p3596_p3 = scmp.lt.s32.totalorder %s3587_s20, %s3587_s20 }
  0x41   : > { %p3590_p9 = pnand %p3588_p1, %p3500_p12  ;;  %p3597_p5 = por %p3596_p3, %p3595_p0 }
  0x42   : > { %3120 = dma.hbm_to_vmem [thread:$0]  (!%p3891_p11), %s4568_s3, 4096, %s361_s18, [#allocation6], %s4551_s26, %s4551_s26, %s4552_s15  }
  0x43   : > { %p3591_p13 = pneg %p3590_p9 }
  0x45   : > { %p3598_p10 = pnand %p3597_p5, %p3591_p13 }
  0x47   : > { %3601 = shalt.err (!%p3598_p10)
}
  0x48   : > { %s4569_s13 = smov 64   ;;  %s4570_s7 = sld [smem:[#allocation26_spill]] }
  0x49   : > { %s3942_s20 = sadd.s32 1, %s3758_s24   ;;  %s41_s14 = sadd.s32 1, %s3754_s23 }
  0x4a   : > { %s38_s16 = ssub.s32 %s3758_s24, %s3942_s20  ;;  %p48_p12 = scmp.ne.s32.totalorder %s3754_s23, %s3750_s22 }
  0x4b   : > { %p39_p7 = scmp.eq.s32.totalorder %s38_s16, 0  ;;  %p49_p1 = scmp.eq.s32.totalorder %s3758_s24, 0 }
  0x4c   : > { %p3952_p9 = por %p267_p2, %p48_p12  ;;  %p3145_p13 = scmp.lt.s32.totalorder %s3758_s24, 2 }
  0x4d   : > { %s3958_s18 = scalar_select %p39_p7, %s3754_s23, %s41_s14  }
  0x4e   : > { %3126 = dma.hbm_to_vmem [thread:$0]  (!%p3891_p11), %s4570_s7, 1024, %s393_s19, [#allocation9], %s4569_s13, %s4569_s13, %s3764_s30  }
  0x4f   : > { %s4571_s17 = scalar_select %p3952_p9, 1, 0 }
  0x50   : > { %4572 = sst [smem:[#allocation21_spill]] %s3958_s18  ;;  %p50_p0 = por %p49_p1, %p48_p12 }
  0x51   : > { %s412_s28 = sand.u32 1, %s3754_s23   ;;  %s2737_s30 = sshll.u32 %s3758_s24, 12 }
  0x52   : > { %s2564_s26 = sshll.u32 %s412_s28, 8  ;;  %s4573_s0 = sld [smem:[#allocation22_spill]] }
  0x53   : > { %s416_s16 = scalar_lea.vmem [#allocation2], %s2564_s26  ;;  %p3969_p2 = pnand %p3145_p13, %p50_p0 }
  0x54   : > { %s424_s1 = sshll.u32 %s416_s16, 4  ;;  %s3973_s14 = scalar_lea.sflag [#allocation3], %s412_s28  ;;  %s3967_s1 = int_to_ptr.vmem [resolvable:$true] %s424_s1 }
  0x55   : > { %p3604_p3 = pneg %p3969_p2 }
  0x58   : > { %s3965_s15 = scalar_lea.hbm %s4573_s0, %s2737_s30  ;;  %s3607_s26 = scalar_lea.hbm %s4573_s0, 8192 }
  0x59   : > { %s3602_s5 = scalar_lea.hbm %s3965_s15, 4096  ;;  %p3608_p12 = scmp.lt.s32.totalorder %s3965_s15, %s4573_s0 }
  0x5a   : > { %p3603_p11 = scmp.ne.s32.totalorder %s3965_s15, %s3602_s5  ;;  %p3609_p7 = scmp.lt.s32.totalorder %s3607_s26, %s3602_s5 }
  0x5c   : > { %p3605_p5 = pnand %p3604_p3, %p3603_p11  ;;  %p3610_p1 = por %p3609_p7, %p3608_p12 }
  0x5e   : > { %p3606_p10 = pneg %p3605_p5 }
  0x60   : > { %p3611_p13 = pnand %p3610_p1, %p3606_p10 }
  0x62   : > { %3614 = shalt.err (!%p3611_p13)
}
  0x63   : > { %s3615_s28 = scalar_lea.vmem %s3967_s1, 4096  ;;  %s3768_s7 = smov [#allocation2]  }
  0x64   : > { %p3616_p0 = scmp.ne.s32.totalorder %s3967_s1, %s3615_s28  ;;  %s3620_s18 = sshll.u32 %s3768_s7, 4  ;;  %s3621_s18 = int_to_ptr.vmem [resolvable:$false] %s3620_s18 }
  0x65   : > { %s3622_s30 = scalar_lea.vmem %s3621_s18, 8192  ;;  %p3623_p5 = scmp.lt.s32.totalorder %s3967_s1, %s3621_s18 }
  0x66   : > { %p3618_p6 = pnand %p3616_p0, %p3604_p3  ;;  %p3624_p9 = scmp.lt.s32.totalorder %s3622_s30, %s3615_s28 }
  0x68   : > { %p3619_p11 = pneg %p3618_p6  ;;  %p3625_p4 = por %p3624_p9, %p3623_p5 }
  0x6a   : > { %p3626_p8 = pnand %p3625_p4, %p3619_p11 }
  0x6c   : > { %3629 = shalt.err (!%p3626_p8)
}
  0x6d   : > { %s4575_s5 = smov 16   ;;  %s4576_s19 = smov 256  }
  0x6e   : > { %3130 = dma.hbm_to_vmem [thread:$0]  (!%p3969_p2), %s3965_s15, 4096, %s3967_s1, %s3973_s14, %s4576_s19, %s4576_s19, %s4575_s5  }
  0x6f   : > { %p4577_p6 = scmp.ne.s32.totalorder %s4564_s29, 0 }
  0x70   : > { %s4000_s7 = sand.u32 (!%p4577_p6), 1, %s3750_s22   ;;  %p4578_p4 = scmp.ne.s32.totalorder (!%p4577_p6), %s4561_s27, 0 }
  0x71   : > { %436 = sbr.rel (%p4577_p6) target bundleno = 1361 (0x551), region = 60  ;;  %s2569_s18 = sshll.u32 (!%p4577_p6), %s4000_s7, 8 }
  0x72   : > { %s439_s26 = scalar_lea.sflag (!%p4577_p6), [#allocation3], %s4000_s7  ;;  %s4004_s13 = scalar_lea.vmem (!%p4577_p6), [#allocation2], %s2569_s18 }
  0x76   : > { %3725 = dma.done.wait (%p4578_p4), %s439_s26, 4096  }
  0x77   : > { %3727 = vsyncadd (%p4578_p4), %s439_s26, 4294963200  ;;  %p4579_p8 = scmp.eq.s32.totalorder %s3861_s25, 0 }
  0x79   : > { %3729 = dma.done.wait (%p4579_p8), [#allocation6], 6144   ;;  %p4580_p9 = pmov %p4579_p8 }
  0x7a   : > { %p4581_p2 = pmov %p4579_p8 }
  0x7b   : > { %3731 = vsyncadd (%p4580_p9), [#allocation6], 4294961152 }
  0x7c   : > { %3733 = dma.done.wait (%p4581_p2), [#allocation9], 2048   ;;  %p4582_p3 = pmov %p4581_p2 }
  0x7d   : > { %v3194_v0 = vld [vmem:[#allocation5 + $0x78] sm:$0xff]   ;;  %v3196_v2 = vld [vmem:[#allocation5 + $0x70] sm:$0xff]   ;;  %v3198_v4 = vld [vmem:[#allocation5 + $0x68] sm:$0xff]   ;;  %s4060_s27 = sshll.u32 %s4000_s7, 6  ;;  %s2334_s1 = sand.u32 1, %s3861_s25  }
  0x7e   : > { %3735 = vsyncadd (%p4582_p3), [#allocation9], 4294965248  ;;  %v3195_v1 = vld [vmem:[#allocation5 + $0x38] sm:$0xff]   ;;  %2930 = vmatprep.subr.bf16.mxu0 %v3194_v0  ;;  %v3197_v3 = vld [vmem:[#allocation5 + $0x30] sm:$0xff]   ;;  %s4064_s29 = scalar_lea.vmem [#allocation14], %s4060_s27  ;;  %s4237_s30 = scalar_lea.vmem [#allocation12], %s4060_s27 }
  0x7f   : > { %2931 = vmatpush3.bf16.msra.mxu0 %v3195_v1  ;;  %v3199_v5 = vld [vmem:[#allocation5 + $0x28] sm:$0xff]   ;;  %v3200_v6 = vld [vmem:[#allocation5 + $0x60] sm:$0xff]   ;;  %v3202_v8 = vld [vmem:[#allocation5 + $0x58] sm:$0xff]   ;;  %s4385_s3 = sshll.u32 %s3861_s25, 10  ;;  %s2369_s28 = sshll.u32 %s4237_s30, 4  ;;  %s4396_s28 = int_to_ptr.vmem [resolvable:$true] %s2369_s28 }
  0x80   : > { %2932 = vmatprep.subr.bf16.mxu0 %v3196_v2  ;;  %v3201_v7 = vld [vmem:[#allocation5 + $0x20] sm:$0xff]   ;;  %v3203_v9 = vld [vmem:[#allocation5 + $0x18] sm:$0xff]   ;;  %v3204_v10 = vld [vmem:[#allocation5 + $0x50] sm:$0xff]   ;;  %s4391_s16 = scalar_lea.hbm %s4545_s11, %s4385_s3  ;;  %s4402_s25 = scalar_lea.hbm %s4546_s12, %s4385_s3 }
  0x81   : > { %v515_v11 = vld [vmem:[%s4004_s13 + $0x8] sm:$0xff]  ;;  %v517_v12 = vld [vmem:[%s4004_s13 + $0x18] sm:$0xff]  ;;  %v3205_v14 = vld [vmem:[#allocation5 + $0x10] sm:$0xff]   ;;  %s3630_s18 = scalar_lea.vmem %s4396_s28, 1024  ;;  %p4583_p12 = scmp.ne.s32.totalorder %s4571_s17, 0 }
  0x82   : > { %v547_v13 = vpack.c.bf16 %v517_v12, %v515_v11  ;;  %v3206_v15 = vld [vmem:[#allocation5 + $0x48] sm:$0xff]   ;;  %v3208_v17 = vld [vmem:[#allocation5 + $0x40] sm:$0xff]   ;;  %v516_v20 = vld [vmem:[%s4004_s13 + $0x10] sm:$0xff]  ;;  %p3631_p10 = scmp.ne.s32.totalorder %s4396_s28, %s3630_s18  ;;  %s3770_s26 = smov [#allocation12]  }
  0x83   : > { %2933 = vmatpush3.bf16.msra.mxu0 %v3197_v3  ;;  %v3207_v16 = vld [vmem:[#allocation5 + $0x8] sm:$0xff]   ;;  %v3209_v18 = vld [vmem:[#allocation5] sm:$0xff]   ;;  %v521_v23 = vld [vmem:[%s4004_s13 + $0x38] sm:$0xff]  ;;  %s3634_s15 = sshll.u32 %s3770_s26, 4  ;;  %s3635_s15 = int_to_ptr.vmem [resolvable:$false] %s3634_s15 }
  0x84   : > { %2934 = vmatprep.subr.bf16.mxu0 %v3198_v4  ;;  %729 = vmatprep.mubr.bf16.mxu0 %v547_v13  ;;  %v514_v19 = vld [vmem:[%s4004_s13] sm:$0xff]  ;;  %v519_v21 = vld [vmem:[%s4004_s13 + $0x28] sm:$0xff]  ;;  %v520_v33 = vld [vmem:[%s4004_s13 + $0x30] sm:$0xff]  ;;  %p3632_p7 = pnand %p3631_p10, %p4583_p12  ;;  %p3637_p13 = scmp.lt.s32.totalorder %s4396_s28, %s3635_s15 }
  0x85   : > { %v3210_v22 = vld [vmem:[#allocation7 + $0xe4] ss:$16 sps:$4 sm:$0xff]   ;;  %v3214_v24 = vld [vmem:[#allocation7 + $0xec] ss:$16 sps:$4 sm:$0xff]   ;;  %v3215_v25 = vld [vmem:[#allocation7 + $0xe0] ss:$16 sps:$4 sm:$0xff]   ;;  %v546_v26 = vpack.c.bf16 %v516_v20, %v514_v19  ;;  %v549_v28 = vpack.c.bf16 %v521_v23, %v519_v21 }
  0x86   : > { %1136 = vmatprep.subr.bf16.mxu1 %v3210_v22  ;;  %v3216_v27 = vld [vmem:[#allocation7 + $0xc4] ss:$16 sps:$4 sm:$0xff]   ;;  %v3212_v29 = vld [vmem:[#allocation7 + $0xe8] ss:$16 sps:$4 sm:$0xff]   ;;  %v3220_v30 = vld [vmem:[#allocation7 + $0xcc] ss:$16 sps:$4 sm:$0xff]   ;;  %p3633_p1 = pneg %p3632_p7 }
  0x87   : > { %2935 = vmatpush3.bf16.msra.mxu0 %v3199_v5  ;;  %1137 = vmatpush1.bf16.msra.mxu1 %v3215_v25  ;;  %v3221_v31 = vld [vmem:[#allocation7 + $0xc0] ss:$16 sps:$4 sm:$0xff]   ;;  %v3222_v34 = vld [vmem:[#allocation7 + $0xa4] ss:$16 sps:$4 sm:$0xff]   ;;  %v523_v35 = vld [vmem:[%s4004_s13 + $0x48] sm:$0xff] }
  0x88   : > { %2936 = vmatprep.subr.bf16.mxu0 %v3200_v6  ;;  %1138 = vmatprep.subr.bf16.mxu1 %v3216_v27  ;;  %v518_v32 = vld [vmem:[%s4004_s13 + $0x20] sm:$0xff]  ;;  %v525_v36 = vld [vmem:[%s4004_s13 + $0x58] sm:$0xff]  ;;  %v524_v47 = vld [vmem:[%s4004_s13 + $0x50] sm:$0xff] }
  0x89   : > { %v3218_v37 = vld [vmem:[#allocation7 + $0xc8] ss:$16 sps:$4 sm:$0xff]   ;;  %v3226_v38 = vld [vmem:[#allocation7 + $0xac] ss:$16 sps:$4 sm:$0xff]   ;;  %v3227_v39 = vld [vmem:[#allocation7 + $0xa0] ss:$16 sps:$4 sm:$0xff]   ;;  %v548_v42 = vpack.c.bf16 %v520_v33, %v518_v32  ;;  %v551_v45 = vpack.c.bf16 %v525_v36, %v523_v35 }
  0x8a   : > { %v3224_v40 = vld [vmem:[#allocation7 + $0xa8] ss:$16 sps:$4 sm:$0xff]   ;;  %v3228_v41 = vld [vmem:[#allocation7 + $0x84] ss:$16 sps:$4 sm:$0xff]   ;;  %v3232_v43 = vld [vmem:[#allocation7 + $0x8c] ss:$16 sps:$4 sm:$0xff]  }
  0x8b   : > { %2937 = vmatpush3.bf16.msra.mxu0 %v3201_v7  ;;  %1139 = vmatpush1.bf16.msra.mxu1 %v3221_v31  ;;  %v3233_v44 = vld [vmem:[#allocation7 + $0x80] ss:$16 sps:$4 sm:$0xff]   ;;  %v3230_v48 = vld [vmem:[#allocation7 + $0x88] ss:$16 sps:$4 sm:$0xff]   ;;  %v3240_v20 = vld [vmem:[#allocation7 + $0x44] ss:$16 sps:$4 sm:$0xff]  }
  0x8c   : > { %2938 = vmatprep.subr.bf16.mxu0 %v3202_v8  ;;  %1140 = vmatprep.subr.bf16.mxu1 %v3222_v34  ;;  %v522_v46 = vld [vmem:[%s4004_s13 + $0x40] sm:$0xff]  ;;  %v527_v49 = vld [vmem:[%s4004_s13 + $0x68] sm:$0xff]  ;;  %v529_v50 = vld [vmem:[%s4004_s13 + $0x78] sm:$0xff]  ;;  %v3769_v32 = vmov 0  }
  0x8d   : > { %v550_v51 = vpack.c.bf16 %v524_v47, %v522_v46  ;;  %v553_v52 = vpack.c.bf16 %v529_v50, %v527_v49  ;;  %v526_v53 = vld [vmem:[%s4004_s13 + $0x60] sm:$0xff]  ;;  %v528_v54 = vld [vmem:[%s4004_s13 + $0x70] sm:$0xff]  ;;  %v531_v55 = vld [vmem:[%s4004_s13 + $0x88] sm:$0xff]  ;;  %1168 = vmatprep.mubr.bf16.mxu1 %v3769_v32 }
  0x8e   : > { %v533_v56 = vld [vmem:[%s4004_s13 + $0x98] sm:$0xff]  ;;  %v552_v57 = vpack.c.bf16 %v528_v54, %v526_v53  ;;  %v530_v59 = vld [vmem:[%s4004_s13 + $0x80] sm:$0xff]  ;;  %v532_v60 = vld [vmem:[%s4004_s13 + $0x90] sm:$0xff] }
  0x8f   : > { %2939 = vmatpush3.bf16.msra.mxu0 %v3203_v9  ;;  %1141 = vmatpush1.bf16.msra.mxu1 %v3227_v39  ;;  %v555_v58 = vpack.c.bf16 %v533_v56, %v531_v55  ;;  %v535_v61 = vld [vmem:[%s4004_s13 + $0xa8] sm:$0xff]  ;;  %v537_v62 = vld [vmem:[%s4004_s13 + $0xb8] sm:$0xff]  ;;  %v554_v63 = vpack.c.bf16 %v532_v60, %v530_v59  ;;  %v534_v1 = vld [vmem:[%s4004_s13 + $0xa0] sm:$0xff] }
  0x90   : > { %2940 = vmatprep.subr.bf16.mxu0 %v3204_v10  ;;  %1142 = vmatprep.subr.bf16.mxu1 %v3228_v41  ;;  %v557_v0 = vpack.c.bf16 %v537_v62, %v535_v61  ;;  %v536_v2 = vld [vmem:[%s4004_s13 + $0xb0] sm:$0xff]  ;;  %v539_v3 = vld [vmem:[%s4004_s13 + $0xc8] sm:$0xff]  ;;  %v541_v4 = vld [vmem:[%s4004_s13 + $0xd8] sm:$0xff] }
  0x91   : > { %v556_v5 = vpack.c.bf16 %v536_v2, %v534_v1  ;;  %v559_v6 = vpack.c.bf16 %v541_v4, %v539_v3  ;;  %v538_v7 = vld [vmem:[%s4004_s13 + $0xc0] sm:$0xff]  ;;  %v540_v8 = vld [vmem:[%s4004_s13 + $0xd0] sm:$0xff]  ;;  %v543_v9 = vld [vmem:[%s4004_s13 + $0xe8] sm:$0xff] }
  0x92   : > { %v545_v10 = vld [vmem:[%s4004_s13 + $0xf8] sm:$0xff]  ;;  %v558_v11 = vpack.c.bf16 %v540_v8, %v538_v7  ;;  %v542_v13 = vld [vmem:[%s4004_s13 + $0xe0] sm:$0xff]  ;;  %v3259_v55 = vld [vmem:[#allocation8 + $0x30] sm:$0xff]  }
  0x93   : > { %2941 = vmatpush3.bf16.msra.mxu0 %v3205_v14  ;;  %1143 = vmatpush1.bf16.msra.mxu1 %v3233_v44  ;;  %v561_v12 = vpack.c.bf16 %v545_v10, %v543_v9  ;;  %v544_v14 = vld [vmem:[%s4004_s13 + $0xf0] sm:$0xff]  ;;  %v3244_v21 = vld [vmem:[#allocation7 + $0x4c] ss:$16 sps:$4 sm:$0xff]   ;;  %v3242_v22 = vld [vmem:[#allocation7 + $0x48] ss:$16 sps:$4 sm:$0xff]   ;;  %s2385_s13 = sshll.u32 %s4064_s29, 4  ;;  %s4393_s13 = int_to_ptr.vmem [resolvable:$true] %s2385_s13 }
  0x94   : > { %2942 = vmatprep.subr.bf16.mxu0 %v3206_v15  ;;  %v560_v15 = vpack.c.bf16 %v544_v14, %v542_v13  ;;  %v3239_v19 = vld [vmem:[#allocation7 + $0x60] ss:$16 sps:$4 sm:$0xff]   ;;  %v3250_v25 = vld [vmem:[#allocation7 + $0x2c] ss:$16 sps:$4 sm:$0xff]  }
  0x95   : > { %v3245_v23 = vld [vmem:[#allocation7 + $0x40] ss:$16 sps:$4 sm:$0xff]   ;;  %v3258_v33 = vld [vmem:[#allocation8 + $0x38] sm:$0xff]   ;;  %v3260_v62 = vld [vmem:[#allocation8 + $0x28] sm:$0xff]  }
  0x96   : > { %v3251_v27 = vld [vmem:[#allocation7 + $0x20] ss:$16 sps:$4 sm:$0xff]  }
  0x97   : > { %2943 = vmatpush3.bf16.msra.mxu0 %v3207_v16  ;;  %v3234_v16 = vld [vmem:[#allocation7 + $0x64] ss:$16 sps:$4 sm:$0xff]   ;;  %v3257_v31 = vld [vmem:[#allocation7] ss:$16 sps:$4 sm:$0xff]  }
  0x98   : > { %2944 = vmatprep.subr.bf16.mxu0 %v3208_v17  ;;  %v3238_v17 = vld [vmem:[#allocation7 + $0x6c] ss:$16 sps:$4 sm:$0xff]   ;;  %1144 = vmatprep.subr.bf16.mxu1 %v3234_v16  ;;  %v4055_v35 = vld [vmem:[%s4536_s2] ss:$0 sm:$0xff] }
  0x99   : > { %1145 = vmatpush1.bf16.msra.mxu1 %v3239_v19 }
  0x9a   : > { %1146 = vmatprep.subr.bf16.mxu1 %v3240_v20 }
  0x9b   : > { %2945 = vmatpush3.bf16.msra.mxu0 %v3209_v18  ;;  %v3236_v18 = vld [vmem:[#allocation7 + $0x68] ss:$16 sps:$4 sm:$0xff]  }
  0x9c   : > { %1249 = vmatprep.subr.bf16.mxu0 %v3214_v24  ;;  %v3246_v24 = vld [vmem:[#allocation7 + $0x24] ss:$16 sps:$4 sm:$0xff]  }
  0x9d   : > { %1147 = vmatpush1.bf16.msra.mxu1 %v3245_v23 }
  0x9e   : > { %730 = vmatmul.mubr.bf16.vlgmr.msra.gmra.mxu0 %v546_v26  ;;  %v3248_v26 = vld [vmem:[#allocation7 + $0x28] ss:$16 sps:$4 sm:$0xff]   ;;  %1148 = vmatprep.subr.bf16.mxu1 %v3246_v24 }
  0x9f   : > { %737 = vmatprep.mubr.bf16.mxu0 %v549_v28  ;;  %1250 = vmatpush1.bf16.msra.mxu0 %v3212_v29  ;;  %v3252_v28 = vld [vmem:[#allocation7 + $0x4] ss:$16 sps:$4 sm:$0xff]   ;;  %v3256_v29 = vld [vmem:[#allocation7 + $0xc] ss:$16 sps:$4 sm:$0xff]  }
  0xa0   : > { %1251 = vmatprep.subr.bf16.mxu0 %v3220_v30  ;;  %v3254_v30 = vld [vmem:[#allocation7 + $0x8] ss:$16 sps:$4 sm:$0xff]  }
  0xa1   : > { %1149 = vmatpush1.bf16.msra.mxu1 %v3251_v27 }
  0xa2   : > { %1150 = vmatprep.subr.bf16.mxu1 %v3252_v28 }
  0xa3   : > { %1252 = vmatpush1.bf16.msra.mxu0 %v3218_v37 }
  0xa4   : > { %1253 = vmatprep.subr.bf16.mxu0 %v3226_v38 }
  0xa5   : > { %1151 = vmatpush1.bf16.msra.mxu1 %v3257_v31 }
  0xa6   : > { %738 = vmatmul.mubr.bf16.gmra.mxu0 %v548_v42  ;;  %3026 = vmatprep.subr.bf16.mxu1 %v3258_v33 }
  0xa7   : > { %745 = vmatprep.mubr.bf16.mxu0 %v551_v45  ;;  %1254 = vmatpush1.bf16.msra.mxu0 %v3224_v40 }
  0xa8   : > { %1255 = vmatprep.subr.bf16.mxu0 %v3232_v43 }
  0xab   : > { %1256 = vmatpush1.bf16.msra.mxu0 %v3230_v48 }
  0xac   : > { %1257 = vmatprep.subr.bf16.mxu0 %v3238_v17 }
  0xae   : > { %746 = vmatmul.mubr.bf16.gmra.mxu0 %v550_v51 }
  0xaf   : > { %753 = vmatprep.mubr.bf16.mxu0 %v553_v52  ;;  %1258 = vmatpush1.bf16.msra.mxu0 %v3236_v18 }
  0xb0   : > { %1259 = vmatprep.subr.bf16.mxu0 %v3244_v21 }
  0xb3   : > { %1260 = vmatpush1.bf16.msra.mxu0 %v3242_v22 }
  0xb4   : > { %1261 = vmatprep.subr.bf16.mxu0 %v3250_v25 }
  0xb6   : > { %754 = vmatmul.mubr.bf16.gmra.mxu0 %v552_v57 }
  0xb7   : > { %761 = vmatprep.mubr.bf16.mxu0 %v555_v58  ;;  %1262 = vmatpush1.bf16.msra.mxu0 %v3248_v26 }
  0xb8   : > { %1263 = vmatprep.subr.bf16.mxu0 %v3256_v29 }
  0xbb   : > { %1264 = vmatpush1.bf16.msra.mxu0 %v3254_v30 }
  0xbe   : > { %762 = vmatmul.mubr.bf16.gmra.mxu0 %v554_v63 }
  0xbf   : > { %769 = vmatprep.mubr.bf16.mxu0 %v557_v0 }
  0xc6   : > { %770 = vmatmul.mubr.bf16.gmra.mxu0 %v556_v5 }
  0xc7   : > { %777 = vmatprep.mubr.bf16.mxu0 %v559_v6  ;;  %v3261_v6 = vld [vmem:[#allocation8 + $0x20] sm:$0xff]  }
  0xce   : > { %778 = vmatmul.mubr.bf16.gmra.mxu0 %v558_v11 }
  0xcf   : > { %785 = vmatprep.mubr.bf16.mxu0 %v561_v12 }
  0xd6   : > { %786 = vmatmul.mubr.bf16.gmra.mxu0 %v560_v15 }
  0xd7   : > { %1281 = vmatprep.mubr.bf16.mxu0 %v3769_v32 }
 0x15e   : > { %v2946_v34 = vpop.f32.mrf.mxu0 }
 0x160   : > { %v2947_v36 = vpop.f32.mrf.mxu0 }
 0x161   : > { %v2948_v37 = vadd.f32 %v2947_v36, %v2946_v34 }
 0x162   : > { %v2949_v38 = vpop.f32.mrf.mxu0 }
 0x163   : > { %v732_v39 = vadd.f32 %v2948_v37, %v4055_v35 }
 0x164   : > { %v2950_v40 = vpop.f32.mrf.mxu0 }
 0x165   : > { %v2951_v41 = vadd.f32 %v2950_v40, %v2949_v38  ;;  %v810_v43 = vmul.f32 0.2, %v732_v39  ;;  %vm794_vm0 = vcmp.gt.f32.partialorder %v732_v39, 0.0 }
 0x166   : > { %v2952_v42 = vpop.f32.mrf.mxu0 }
 0x167   : > { %v735_v44 = vadd.f32 %v2951_v41, %v4055_v35  ;;  %v826_v50 = vsel %vm794_vm0, %v732_v39, %v810_v43 }
 0x168   : > { %v2953_v45 = vpop.f32.mrf.mxu0 }
 0x169   : > { %vm795_vm1 = vcmp.gt.f32.partialorder %v735_v44, 0.0  ;;  %v811_v46 = vmul.f32 0.2, %v735_v44  ;;  %v2954_v47 = vadd.f32 %v2953_v45, %v2952_v42 }
 0x16a   : > { %v2955_v48 = vpop.f32.mrf.mxu0 }
 0x16b   : > { %v740_v49 = vadd.f32 %v2954_v47, %v4055_v35  ;;  %v827_v51 = vsel %vm795_vm1, %v735_v44, %v811_v46 }
 0x16c   : > { %v2956_v52 = vpop.f32.mrf.mxu0  ;;  %v842_v53 = vpack.c.bf16 %v827_v51, %v826_v50 }
 0x16d   : > { %v2957_v54 = vadd.f32 %v2956_v52, %v2955_v48  ;;  %v812_v57 = vmul.f32 0.2, %v740_v49  ;;  %vm796_vm2 = vcmp.gt.f32.partialorder %v740_v49, 0.0 }
 0x16e   : > { %v2958_v56 = vpop.f32.mrf.mxu0  ;;  %2793 = vst [vmem:[%s4064_s29] sm:$0xff] %v842_v53   ;;  %1169 = vmatmul.mubr.bf16.vlgmr.msra.gmra.mxu1 %v842_v53  ;;  %1282 = vmatmul.mubr.bf16.vlgmr.msra.gmra.mxu0 %v842_v53 }
 0x16f   : > { %v743_v58 = vadd.f32 %v2957_v54, %v4055_v35  ;;  %1178 = vmatprep.mubr.bf16.mxu1 %v3769_v32  ;;  %1291 = vmatprep.mubr.bf16.mxu0 %v3769_v32  ;;  %v828_v1 = vsel %vm796_vm2, %v740_v49, %v812_v57 }
 0x170   : > { %v2959_v59 = vpop.f32.mrf.mxu0  ;;  %3027 = vmatpush3.bf16.msra.mxu1 %v3258_v33 }
 0x171   : > { %vm797_vm3 = vcmp.gt.f32.partialorder %v743_v58, 0.0  ;;  %v813_v60 = vmul.f32 0.2, %v743_v58  ;;  %v2960_v61 = vadd.f32 %v2959_v59, %v2958_v56  ;;  %3028 = vmatprep.subr.bf16.mxu1 %v3259_v55 }
 0x172   : > { %v2961_v63 = vpop.f32.mrf.mxu0 }
 0x173   : > { %v748_v0 = vadd.f32 %v2960_v61, %v4055_v35  ;;  %v829_v2 = vsel %vm797_vm3, %v743_v58, %v813_v60 }
 0x174   : > { %v2962_v3 = vpop.f32.mrf.mxu0  ;;  %v843_v4 = vpack.c.bf16 %v829_v2, %v828_v1  ;;  %3029 = vmatpush3.bf16.msra.mxu1 %v3259_v55 }
 0x175   : > { %v2963_v5 = vadd.f32 %v2962_v3, %v2961_v63  ;;  %3030 = vmatprep.subr.bf16.mxu1 %v3260_v62  ;;  %v814_v8 = vmul.f32 0.2, %v748_v0  ;;  %vm798_vm4 = vcmp.gt.f32.partialorder %v748_v0, 0.0 }
 0x176   : > { %v2964_v7 = vpop.f32.mrf.mxu0  ;;  %2909 = vst [vmem:[%s4064_s29 + $0x8] sm:$0xff] %v843_v4   ;;  %1179 = vmatmul.mubr.bf16.gmra.mxu1 %v843_v4  ;;  %1292 = vmatmul.mubr.bf16.gmra.mxu0 %v843_v4 }
 0x177   : > { %v751_v9 = vadd.f32 %v2963_v5, %v4055_v35  ;;  %1188 = vmatprep.mubr.bf16.mxu1 %v3769_v32  ;;  %1301 = vmatprep.mubr.bf16.mxu0 %v3769_v32  ;;  %v830_v15 = vsel %vm798_vm4, %v748_v0, %v814_v8 }
 0x178   : > { %v2965_v10 = vpop.f32.mrf.mxu0  ;;  %3031 = vmatpush3.bf16.msra.mxu1 %v3260_v62 }
 0x179   : > { %vm799_vm5 = vcmp.gt.f32.partialorder %v751_v9, 0.0  ;;  %v815_v11 = vmul.f32 0.2, %v751_v9  ;;  %v2966_v12 = vadd.f32 %v2965_v10, %v2964_v7  ;;  %3032 = vmatprep.subr.bf16.mxu1 %v3261_v6 }
 0x17a   : > { %v2967_v13 = vpop.f32.mrf.mxu0 }
 0x17b   : > { %v756_v14 = vadd.f32 %v2966_v12, %v4055_v35  ;;  %v831_v16 = vsel %vm799_vm5, %v751_v9, %v815_v11 }
 0x17c   : > { %v2968_v17 = vpop.f32.mrf.mxu0  ;;  %v844_v18 = vpack.c.bf16 %v831_v16, %v830_v15  ;;  %3033 = vmatpush3.bf16.msra.mxu1 %v3261_v6  ;;  %v3262_v16 = vld [vmem:[#allocation8 + $0x18] sm:$0xff]  }
 0x17d   : > { %v2969_v19 = vadd.f32 %v2968_v17, %v2967_v13  ;;  %v816_v21 = vmul.f32 0.2, %v756_v14  ;;  %vm800_vm6 = vcmp.gt.f32.partialorder %v756_v14, 0.0  ;;  %3034 = vmatprep.subr.bf16.mxu1 %v3262_v16  ;;  %v3263_v17 = vld [vmem:[#allocation8 + $0x10] sm:$0xff]  }
 0x17e   : > { %v2970_v20 = vpop.f32.mrf.mxu0  ;;  %2910 = vst [vmem:[%s4064_s29 + $0x10] sm:$0xff] %v844_v18   ;;  %1189 = vmatmul.mubr.bf16.gmra.mxu1 %v844_v18  ;;  %1302 = vmatmul.mubr.bf16.gmra.mxu0 %v844_v18  ;;  %v3265_v18 = vld [vmem:[#allocation8] sm:$0xff]  }
 0x17f   : > { %v759_v22 = vadd.f32 %v2969_v19, %v4055_v35  ;;  %1198 = vmatprep.mubr.bf16.mxu1 %v3769_v32  ;;  %1311 = vmatprep.mubr.bf16.mxu0 %v3769_v32  ;;  %v832_v28 = vsel %vm800_vm6, %v756_v14, %v816_v21  ;;  %v4107_v21 = vld [vmem:[%s4538_s4] sm:$0xf] }
 0x180   : > { %v2971_v23 = vpop.f32.mrf.mxu0  ;;  %3035 = vmatpush3.bf16.msra.mxu1 %v3262_v16 }
 0x181   : > { %vm801_vm7 = vcmp.gt.f32.partialorder %v759_v22, 0.0  ;;  %v817_v24 = vmul.f32 0.2, %v759_v22  ;;  %v2972_v25 = vadd.f32 %v2971_v23, %v2970_v20  ;;  %3036 = vmatprep.subr.bf16.mxu1 %v3263_v17 }
 0x182   : > { %v2973_v26 = vpop.f32.mrf.mxu0 }
 0x183   : > { %v764_v27 = vadd.f32 %v2972_v25, %v4055_v35  ;;  %v833_v29 = vsel %vm801_vm7, %v759_v22, %v817_v24 }
 0x184   : > { %v2974_v30 = vpop.f32.mrf.mxu0  ;;  %v845_v31 = vpack.c.bf16 %v833_v29, %v832_v28  ;;  %3037 = vmatpush3.bf16.msra.mxu1 %v3263_v17 }
 0x185   : > { %v2975_v33 = vadd.f32 %v2974_v30, %v2973_v26  ;;  %v818_v36 = vmul.f32 0.2, %v764_v27  ;;  %vm802_vm8 = vcmp.gt.f32.partialorder %v764_v27, 0.0 }
 0x186   : > { %v2976_v34 = vpop.f32.mrf.mxu0  ;;  %2911 = vst [vmem:[%s4064_s29 + $0x18] sm:$0xff] %v845_v31   ;;  %1199 = vmatmul.mubr.bf16.gmra.mxu1 %v845_v31  ;;  %1312 = vmatmul.mubr.bf16.gmra.mxu0 %v845_v31 }
 0x187   : > { %v767_v37 = vadd.f32 %v2975_v33, %v4055_v35  ;;  %1208 = vmatprep.mubr.bf16.mxu1 %v3769_v32  ;;  %1321 = vmatprep.mubr.bf16.mxu0 %v3769_v32  ;;  %v834_v43 = vsel %vm802_vm8, %v764_v27, %v818_v36  ;;  %v3266_v36 = vld [vmem:[#allocation10 + $0x38] sm:$0xff]  }
 0x188   : > { %v2977_v38 = vpop.f32.mrf.mxu0 }
 0x189   : > { %vm803_vm9 = vcmp.gt.f32.partialorder %v767_v37, 0.0  ;;  %v819_v39 = vmul.f32 0.2, %v767_v37  ;;  %v2978_v40 = vadd.f32 %v2977_v38, %v2976_v34 }
 0x18a   : > { %v2979_v41 = vpop.f32.mrf.mxu0 }
 0x18b   : > { %v772_v42 = vadd.f32 %v2978_v40, %v4055_v35  ;;  %v835_v44 = vsel %vm803_vm9, %v767_v37, %v819_v39 }
 0x18c   : > { %v2980_v45 = vpop.f32.mrf.mxu0  ;;  %v846_v46 = vpack.c.bf16 %v835_v44, %v834_v43 }
 0x18d   : > { %v2981_v47 = vadd.f32 %v2980_v45, %v2979_v41  ;;  %v820_v49 = vmul.f32 0.2, %v772_v42  ;;  %vm804_vm10 = vcmp.gt.f32.partialorder %v772_v42, 0.0 }
 0x18e   : > { %v2982_v48 = vpop.f32.mrf.mxu0  ;;  %2912 = vst [vmem:[%s4064_s29 + $0x20] sm:$0xff] %v846_v46   ;;  %1209 = vmatmul.mubr.bf16.gmra.mxu1 %v846_v46  ;;  %1322 = vmatmul.mubr.bf16.gmra.mxu0 %v846_v46 }
 0x18f   : > { %v775_v50 = vadd.f32 %v2981_v47, %v4055_v35  ;;  %1218 = vmatprep.mubr.bf16.mxu1 %v3769_v32  ;;  %1331 = vmatprep.mubr.bf16.mxu0 %v3769_v32  ;;  %v836_v56 = vsel %vm804_vm10, %v772_v42, %v820_v49 }
 0x190   : > { %v2983_v51 = vpop.f32.mrf.mxu0 }
 0x191   : > { %vm805_vm11 = vcmp.gt.f32.partialorder %v775_v50, 0.0  ;;  %v821_v52 = vmul.f32 0.2, %v775_v50  ;;  %v2984_v53 = vadd.f32 %v2983_v51, %v2982_v48 }
 0x192   : > { %v2985_v54 = vpop.f32.mrf.mxu0 }
 0x193   : > { %v780_v55 = vadd.f32 %v2984_v53, %v4055_v35  ;;  %v837_v57 = vsel %vm805_vm11, %v775_v50, %v821_v52 }
 0x194   : > { %v2986_v58 = vpop.f32.mrf.mxu0  ;;  %v847_v59 = vpack.c.bf16 %v837_v57, %v836_v56 }
 0x195   : > { %v2987_v60 = vadd.f32 %v2986_v58, %v2985_v54  ;;  %v822_v62 = vmul.f32 0.2, %v780_v55  ;;  %vm806_vm12 = vcmp.gt.f32.partialorder %v780_v55, 0.0 }
 0x196   : > { %v2988_v61 = vpop.f32.mrf.mxu0  ;;  %2913 = vst [vmem:[%s4064_s29 + $0x28] sm:$0xff] %v847_v59   ;;  %1219 = vmatmul.mubr.bf16.gmra.mxu1 %v847_v59  ;;  %1332 = vmatmul.mubr.bf16.gmra.mxu0 %v847_v59 }
 0x197   : > { %v783_v63 = vadd.f32 %v2987_v60, %v4055_v35  ;;  %1228 = vmatprep.mubr.bf16.mxu1 %v3769_v32  ;;  %1341 = vmatprep.mubr.bf16.mxu0 %v3769_v32  ;;  %v838_v5 = vsel %vm806_vm12, %v780_v55, %v822_v62 }
 0x198   : > { %v2989_v0 = vpop.f32.mrf.mxu0 }
 0x199   : > { %vm807_vm13 = vcmp.gt.f32.partialorder %v783_v63, 0.0  ;;  %v823_v1 = vmul.f32 0.2, %v783_v63  ;;  %v2990_v2 = vadd.f32 %v2989_v0, %v2988_v61 }
 0x19a   : > { %v2991_v3 = vpop.f32.mrf.mxu0 }
 0x19b   : > { %v788_v4 = vadd.f32 %v2990_v2, %v4055_v35  ;;  %v839_v6 = vsel %vm807_vm13, %v783_v63, %v823_v1 }
 0x19c   : > { %v2992_v7 = vpop.f32.mrf.mxu0  ;;  %v848_v8 = vpack.c.bf16 %v839_v6, %v838_v5 }
 0x19d   : > { %v2993_v9 = vadd.f32 %v2992_v7, %v2991_v3  ;;  %v824_v10 = vmul.f32 0.2, %v788_v4  ;;  %vm808_vm14 = vcmp.gt.f32.partialorder %v788_v4, 0.0 }
 0x19e   : > { %2914 = vst [vmem:[%s4064_s29 + $0x30] sm:$0xff] %v848_v8   ;;  %1229 = vmatmul.mubr.bf16.gmra.mxu1 %v848_v8  ;;  %1342 = vmatmul.mubr.bf16.gmra.mxu0 %v848_v8 }
 0x19f   : > { %v791_v11 = vadd.f32 %v2993_v9, %v4055_v35  ;;  %1238 = vmatprep.mubr.bf16.mxu1 %v3769_v32  ;;  %1351 = vmatprep.mubr.bf16.mxu0 %v3769_v32  ;;  %v840_v13 = vsel %vm808_vm14, %v788_v4, %v824_v10  ;;  %v3264_v35 = vld [vmem:[#allocation8 + $0x8] sm:$0xff]   ;;  %v956_v32 = vlaneseq  ;;  %v3267_v10 = vld [vmem:[#allocation10 + $0x30] sm:$0xff]  }
 0x1a0   : > { %3038 = vmatprep.subr.bf16.mxu1 %v3264_v35 }
 0x1a1   : > { %vm809_vm15 = vcmp.gt.f32.partialorder %v791_v11, 0.0  ;;  %v825_v12 = vmul.f32 0.2, %v791_v11  ;;  %3039 = vmatpush3.bf16.msra.mxu1 %v3264_v35  ;;  %v4101_v19 = vshrl.u32 %v956_v32, 7 }
 0x1a2   : > { %3040 = vmatprep.subr.bf16.mxu1 %v3265_v18 }
 0x1a3   : > { %v841_v14 = vsel %vm809_vm15, %v791_v11, %v825_v12  ;;  %v966_v20 = vsub.s32 2, %v4101_v19  ;;  %v958_v22 = vsub.s32 0, %v4101_v19  ;;  %v962_v23 = vsub.s32 1, %v4101_v19 }
 0x1a4   : > { %v849_v15 = vpack.c.bf16 %v841_v14, %v840_v13 }
 0x1a5   : > { %3041 = vmatpush3.bf16.msra.mxu1 %v3265_v18  ;;  %v4112_v24 = vrot.slane %v4107_v21, %v966_v20  ;;  %v4115_v25 = vrot.slane %v4107_v21, %v958_v22  ;;  %v4118_v26 = vrot.slane %v4107_v21, %v962_v23  ;;  %v3268_v23 = vld [vmem:[#allocation10 + $0x28] sm:$0xff]  }
 0x1a6   : > { %2915 = vst [vmem:[%s4064_s29 + $0x38] sm:$0xff] %v849_v15   ;;  %1239 = vmatmul.mubr.bf16.gmra.mxu1 %v849_v15  ;;  %1352 = vmatmul.mubr.bf16.gmra.mxu0 %v849_v15  ;;  %s4404_s29 = scalar_lea.sflag [#allocation13], %s2334_s1 }
 0x1a7   : > { %3058 = vmatprep.subr.bf16.mxu1 %v3266_v36 }
 0x22e   : > { %v1170_v27 = vpop.f32.mrf.mxu1  ;;  %v1283_v28 = vpop.f32.mrf.mxu0 }
 0x22f   : > { %v1284_v29 = vadd.f32 %v1283_v28, %v4112_v24  ;;  %v1171_v33 = vadd.f32 %v1170_v27, %v4115_v25 }
 0x230   : > { %v1172_v30 = vpop.f32.mrf.mxu1  ;;  %v4121_v31 = vpop.f32.mrf.mxu0 }
 0x231   : > { %v1173_v34 = vadd.f32 %v1172_v30, %v4118_v26  ;;  %v2692_v42 = vmul.f32 -1.442695, %v1284_v29  ;;  %v1362_v45 = vmax.f32 %v1171_v33, 0.0 }
 0x232   : > { %v1174_v37 = vpop.f32.mrf.mxu1  ;;  %v1287_v38 = vpop.f32.mrf.mxu0 }
 0x233   : > { %v2676_v39 = vmul.f32 -1.442695, %v1173_v34  ;;  %v1175_v40 = vadd.f32 %v1174_v37, %v4115_v25  ;;  %v1288_v41 = vadd.f32 %v1287_v38, %v4112_v24 }
 0x234   : > { %v1176_v43 = vpop.f32.mrf.mxu1  ;;  %v4127_v44 = vpop.f32.mrf.mxu0 }
 0x235   : > { %3274 = vpow2.f32 %v2676_v39  ;;  %v1363_v46 = vmax.f32 %v1175_v40, 0.0  ;;  %v1177_v47 = vadd.f32 %v1176_v43, %v4118_v26  ;;  %v2693_v48 = vmul.f32 -1.442695, %v1288_v41 }
 0x236   : > { %v1180_v49 = vpop.f32.mrf.mxu1  ;;  %v1293_v50 = vpop.f32.mrf.mxu0  ;;  %3276 = vpow2.f32 %v2692_v42 }
 0x237   : > { %v1378_v51 = vpack.c.bf16 %v1363_v46, %v1362_v45  ;;  %v2677_v52 = vmul.f32 -1.442695, %v1177_v47  ;;  %v1181_v53 = vadd.f32 %v1180_v49, %v4115_v25  ;;  %v1294_v54 = vadd.f32 %v1293_v50, %v4112_v24  ;;  %v3269_v46 = vld [vmem:[#allocation10 + $0x20] sm:$0xff]  }
 0x238   : > { %v1182_v55 = vpop.f32.mrf.mxu1  ;;  %v4132_v56 = vpop.f32.mrf.mxu0 }
 0x239   : > { %3278 = vpow2.f32 %v2677_v52  ;;  %v1183_v57 = vadd.f32 %v1182_v55, %v4118_v26  ;;  %3042 = vmatprep.mubr.bf16.mxu1 %v1378_v51  ;;  %v2694_v58 = vmul.f32 -1.442695, %v1294_v54  ;;  %v1364_v0 = vmax.f32 %v1181_v53, 0.0 }
 0x23a   : > { %3280 = vpow2.f32 %v2693_v48  ;;  %v1184_v59 = vpop.f32.mrf.mxu1  ;;  %v1297_v60 = vpop.f32.mrf.mxu0  ;;  %v970_v54 = vsub.s32 3, %v4101_v19 }
 0x23b   : > { %v2678_v61 = vmul.f32 -1.442695, %v1183_v57  ;;  %v1185_v62 = vadd.f32 %v1184_v59, %v4115_v25  ;;  %v1298_v63 = vadd.f32 %v1297_v60, %v4112_v24 }
 0x23c   : > { %v1186_v1 = vpop.f32.mrf.mxu1  ;;  %v4137_v2 = vpop.f32.mrf.mxu0 }
 0x23d   : > { %3282 = vpow2.f32 %v2678_v61  ;;  %v1365_v3 = vmax.f32 %v1185_v62, 0.0  ;;  %v2695_v4 = vmul.f32 -1.442695, %v1298_v63  ;;  %v1187_v5 = vadd.f32 %v1186_v1, %v4118_v26  ;;  %v3270_v63 = vld [vmem:[#allocation10 + $0x18] sm:$0xff]  }
 0x23e   : > { %3284 = vpow2.f32 %v2694_v58  ;;  %v1190_v6 = vpop.f32.mrf.mxu1  ;;  %v1303_v7 = vpop.f32.mrf.mxu0 }
 0x23f   : > { %v1379_v8 = vpack.c.bf16 %v1365_v3, %v1364_v0  ;;  %v2679_v9 = vmul.f32 -1.442695, %v1187_v5  ;;  %3286 = vpow2.f32 %v2695_v4  ;;  %v1304_v11 = vadd.f32 %v1303_v7, %v4112_v24 }
 0x240   : > { %v1192_v12 = vpop.f32.mrf.mxu1  ;;  %v4141_v13 = vpop.f32.mrf.mxu0  ;;  %v1191_v14 = vadd.f32 %v1190_v6, %v4115_v25 }
 0x241   : > { %3288 = vpow2.f32 %v2679_v9  ;;  %v1193_v15 = vadd.f32 %v1192_v12, %v4118_v26  ;;  %3043 = vmatmul.mubr.bf16.vlgmr.msra.gmra.mxu1 %v1379_v8  ;;  %v2696_v17 = vmul.f32 -1.442695, %v1304_v11  ;;  %v4161_v8 = vrot.slane %v4107_v21, %v970_v54 }
 0x242   : > { %v3275_v16 = vpop.eup %3274  ;;  %v1194_v35 = vpop.f32.mrf.mxu1  ;;  %3059 = vmatpush3.bf16.msra.mxu1 %v3266_v36  ;;  %v1366_v33 = vmax.f32 %v1191_v14, 0.0 }
 0x243   : > { %v1307_v18 = vpop.f32.mrf.mxu0  ;;  %v2018_v32 = vadd.f32 1.0, %v3275_v16  ;;  %v2680_v20 = vmul.f32 -1.442695, %v1193_v15  ;;  %v1195_v22 = vadd.f32 %v1194_v35, %v4115_v25  ;;  %3060 = vmatprep.subr.bf16.mxu1 %v3267_v10  ;;  %3290 = vpow2.f32 %v2696_v17  ;;  %v3277_v30 = vpop.eup %3276  ;;  %v4167_v16 = vld [vmem:[%s4543_s9] ss:$0 sm:$0xff] }
 0x244   : > { %v1308_v27 = vadd.f32 %v1307_v18, %v4112_v24  ;;  %v1196_v28 = vpop.f32.mrf.mxu1  ;;  %v2114_v47 = vadd.f32 1.0, %v3277_v30 }
 0x245   : > { %v4147_v29 = vpop.f32.mrf.mxu0  ;;  %3292 = vrcp.f32 %v2018_v32  ;;  %v1367_v34 = vmax.f32 %v1195_v22, 0.0  ;;  %v1197_v37 = vadd.f32 %v1196_v28, %v4118_v26  ;;  %v1286_v28 = vadd.f32 %v4121_v31, %v4161_v8 }
 0x246   : > { %v3279_v38 = vpop.eup %3278  ;;  %3294 = vpow2.f32 %v2680_v20  ;;  %v1200_v36 = vpop.f32.mrf.mxu1  ;;  %3061 = vmatpush3.bf16.msra.mxu1 %v3267_v10  ;;  %v2697_v43 = vmul.f32 -1.442695, %v1308_v27 }
 0x247   : > { %v1313_v39 = vpop.f32.mrf.mxu0  ;;  %v3281_v40 = vpop.eup %3280  ;;  %v2019_v41 = vadd.f32 1.0, %v3279_v38  ;;  %v1380_v42 = vpack.c.bf16 %v1367_v34, %v1366_v33  ;;  %v2681_v45 = vmul.f32 -1.442695, %v1197_v37  ;;  %3062 = vmatprep.subr.bf16.mxu1 %v3268_v23  ;;  %v1201_v51 = vadd.f32 %v1200_v36, %v4115_v25 }
 0x248   : > { %v1314_v48 = vadd.f32 %v1313_v39, %v4112_v24  ;;  %v1202_v49 = vpop.f32.mrf.mxu1  ;;  %v2115_v55 = vadd.f32 1.0, %v3281_v40 }
 0x249   : > { %v4151_v50 = vpop.f32.mrf.mxu0  ;;  %3296 = vrcp.f32 %v2019_v41  ;;  %v1203_v52 = vadd.f32 %v1202_v49, %v4118_v26  ;;  %3046 = vmatprep.mubr.bf16.mxu1 %v1380_v42  ;;  %v1368_v19 = vmax.f32 %v1201_v51, 0.0 }
 0x24a   : > { %v3283_v53 = vpop.eup %3282  ;;  %3298 = vpow2.f32 %v2681_v45  ;;  %v1204_v57 = vpop.f32.mrf.mxu1  ;;  %3063 = vmatpush3.bf16.msra.mxu1 %v3268_v23  ;;  %v2698_v61 = vmul.f32 -1.442695, %v1314_v48 }
 0x24b   : > { %v1317_v58 = vpop.f32.mrf.mxu0  ;;  %v3285_v59 = vpop.eup %3284  ;;  %v2020_v60 = vadd.f32 1.0, %v3283_v53  ;;  %3300 = vpow2.f32 %v2697_v43  ;;  %v1205_v62 = vadd.f32 %v1204_v57, %v4115_v25  ;;  %3064 = vmatprep.subr.bf16.mxu1 %v3269_v46  ;;  %v2682_v0 = vmul.f32 -1.442695, %v1203_v52 }
 0x24c   : > { %3302 = vrcp.f32 %v2114_v47  ;;  %v1206_v1 = vpop.f32.mrf.mxu1  ;;  %v3287_v4 = vpop.eup %3286  ;;  %v1318_v6 = vadd.f32 %v1317_v58, %v4112_v24  ;;  %v2116_v9 = vadd.f32 1.0, %v3285_v59  ;;  %v1290_v53 = vadd.f32 %v4127_v44, %v4161_v8 }
 0x24d   : > { %v4157_v3 = vpop.f32.mrf.mxu0  ;;  %3304 = vrcp.f32 %v2020_v60  ;;  %v1369_v5 = vmax.f32 %v1205_v62, 0.0  ;;  %v1207_v10 = vadd.f32 %v1206_v1, %v4118_v26  ;;  %v2117_v17 = vadd.f32 1.0, %v3287_v4 }
 0x24e   : > { %v3289_v7 = vpop.eup %3288  ;;  %3306 = vrcp.f32 %v2115_v55  ;;  %v1210_v11 = vpop.f32.mrf.mxu1  ;;  %3065 = vmatpush3.bf16.msra.mxu1 %v3269_v46  ;;  %v2699_v22 = vmul.f32 -1.442695, %v1318_v6 }
 0x24f   : > { %v1323_v12 = vpop.f32.mrf.mxu0  ;;  %v2021_v14 = vadd.f32 1.0, %v3289_v7  ;;  %3308 = vpow2.f32 %v2698_v61  ;;  %v1381_v15 = vpack.c.bf16 %v1369_v5, %v1368_v19  ;;  %3066 = vmatprep.subr.bf16.mxu1 %v3270_v63  ;;  %v2683_v21 = vmul.f32 -1.442695, %v1207_v10 }
 0x250   : > { %3310 = vpow2.f32 %v2682_v0  ;;  %v1211_v35 = vadd.f32 %v1210_v11, %v4115_v25  ;;  %v1212_v18 = vpop.f32.mrf.mxu1  ;;  %v3291_v20 = vpop.eup %3290  ;;  %v1324_v41 = vadd.f32 %v1323_v12, %v4112_v24  ;;  %v1296_v7 = vadd.f32 %v4132_v56, %v4161_v8 }
 0x251   : > { %v4170_v32 = vpop.f32.mrf.mxu0  ;;  %3312 = vrcp.f32 %v2021_v14  ;;  %v1213_v23 = vadd.f32 %v1212_v18, %v4118_v26  ;;  %3047 = vmatmul.mubr.bf16.gmra.mxu1 %v1381_v15  ;;  %v2118_v38 = vadd.f32 1.0, %v3291_v20 }
 0x252   : > { %v3293_v27 = vpop.eup %3292  ;;  %3314 = vrcp.f32 %v2116_v9  ;;  %v1214_v30 = vpop.f32.mrf.mxu1  ;;  %3067 = vmatpush3.bf16.msra.mxu1 %v3270_v63  ;;  %v1370_v40 = vmax.f32 %v1211_v35, 0.0  ;;  %v2700_v59 = vmul.f32 -1.442695, %v1324_v41 }
 0x253   : > { %v1327_v33 = vpop.f32.mrf.mxu0  ;;  %v3295_v34 = vpop.eup %3294  ;;  %v2169_v37 = vmul.f32 %v3293_v27, %v4167_v16  ;;  %3316 = vpow2.f32 %v2683_v21  ;;  %v1215_v36 = vadd.f32 %v1214_v30, %v4115_v25  ;;  %v2684_v45 = vmul.f32 -1.442695, %v1213_v23 }
 0x254   : > { %3318 = vrcp.f32 %v2117_v17  ;;  %v2022_v39 = vadd.f32 1.0, %v3295_v34  ;;  %v1216_v42 = vpop.f32.mrf.mxu1  ;;  %v1328_v0 = vadd.f32 %v1327_v33, %v4112_v24  ;;  %v1300_v30 = vadd.f32 %v4137_v2, %v4161_v8 }
 0x255   : > { %v4178_v43 = vpop.f32.mrf.mxu0  ;;  %v2185_v31 = vadd.f32 %v2169_v37, %v1286_v28  ;;  %3320 = vpow2.f32 %v2699_v22  ;;  %v1371_v46 = vmax.f32 %v1215_v36, 0.0  ;;  %v1217_v48 = vadd.f32 %v1216_v42, %v4118_v26 }
 0x256   : > { %v3297_v47 = vpop.eup %3296  ;;  %3322 = vrcp.f32 %v2022_v39  ;;  %v1220_v49 = vpop.f32.mrf.mxu1  ;;  %v2701_v21 = vmul.f32 -1.442695, %v1328_v0 }
 0x257   : > { %v1333_v51 = vpop.f32.mrf.mxu0  ;;  %v3299_v52 = vpop.eup %3298  ;;  %v2170_v54 = vmul.f32 %v3297_v47, %v4167_v16  ;;  %3324 = vrcp.f32 %v2118_v38  ;;  %v1382_v55 = vpack.c.bf16 %v1371_v46, %v1370_v40  ;;  %v2685_v1 = vmul.f32 -1.442695, %v1217_v48 }
 0x258   : > { %v3301_v57 = vpop.eup %3300  ;;  %3326 = vtanh.f32 %v2185_v31  ;;  %v2023_v58 = vadd.f32 1.0, %v3299_v52  ;;  %v1222_v60 = vpop.f32.mrf.mxu1  ;;  %v1221_v4 = vadd.f32 %v1220_v49, %v4115_v25  ;;  %v1334_v34 = vadd.f32 %v1333_v51, %v4112_v24 }
 0x259   : > { %v4184_v61 = vpop.f32.mrf.mxu0  ;;  %v4186_v62 = vpop.eup %3302  ;;  %v2186_v63 = vadd.f32 %v2170_v54, %v1290_v53  ;;  %3328 = vpow2.f32 %v2684_v45  ;;  %3050 = vmatprep.mubr.bf16.mxu1 %v1382_v55  ;;  %v2119_v10 = vadd.f32 1.0, %v3301_v57  ;;  %v1223_v23 = vadd.f32 %v1222_v60, %v4118_v26 }
 0x25a   : > { %v3305_v44 = vpop.eup %3304  ;;  %3330 = vrcp.f32 %v2023_v58  ;;  %v1224_v19 = vpop.f32.mrf.mxu1  ;;  %v1372_v22 = vmax.f32 %v1221_v4, 0.0  ;;  %v2702_v51 = vmul.f32 -1.442695, %v1334_v34  ;;  %v1306_v53 = vadd.f32 %v4141_v13, %v4161_v8 }
 0x25b   : > { %v4190_v5 = vpop.f32.mrf.mxu0  ;;  %v4192_v6 = vpop.eup %3306  ;;  %3332 = vtanh.f32 %v2186_v63  ;;  %v2171_v9 = vmul.f32 %v3305_v44, %v4167_v16  ;;  %v1225_v12 = vadd.f32 %v1224_v19, %v4115_v25  ;;  %v2686_v47 = vmul.f32 -1.442695, %v1223_v23 }
 0x25c   : > { %v3309_v11 = vpop.eup %3308  ;;  %3334 = vpow2.f32 %v2700_v59  ;;  %v1226_v14 = vpop.f32.mrf.mxu1 }
 0x25d   : > { %v3311_v15 = vpop.eup %3310  ;;  %v2187_v17 = vadd.f32 %v2171_v9, %v1296_v7  ;;  %3336 = vpow2.f32 %v2685_v1  ;;  %v4198_v35 = vpop.f32.mrf.mxu0  ;;  %v1373_v56 = vmax.f32 %v1225_v12, 0.0  ;;  %v2120_v38 = vadd.f32 1.0, %v3309_v11 }
 0x25e   : > { %v3313_v18 = vpop.eup %3312  ;;  %v2024_v20 = vadd.f32 1.0, %v3311_v15  ;;  %v1230_v27 = vpop.f32.mrf.mxu1  ;;  %3338 = vrcp.f32 %v2119_v10  ;;  %v1227_v39 = vadd.f32 %v1226_v14, %v4118_v26  ;;  %v2217_v7 = vsub.f32 1.0, %v4186_v62 }
 0x25f   : > { %v4201_v28 = vpop.eup %3314  ;;  %v2172_v33 = vmul.f32 %v3313_v18, %v4167_v16  ;;  %v1383_v36 = vpack.c.bf16 %v1373_v56, %v1372_v22  ;;  %v1231_v45 = vadd.f32 %v1230_v27, %v4115_v25  ;;  %v4211_v2 = vpop.f32.mrf.mxu0  ;;  %v2218_v9 = vsub.f32 1.0, %v4192_v6 }
 0x260   : > { %v3317_v37 = vpop.eup %3316  ;;  %3340 = vrcp.f32 %v2024_v20  ;;  %v1232_v40 = vpop.f32.mrf.mxu1  ;;  %v2687_v59 = vmul.f32 -1.442695, %v1227_v39  ;;  %v1310_v12 = vadd.f32 %v4147_v29, %v4161_v8  ;;  %v1338_v6 = vadd.f32 %v4190_v5, %v4112_v24 }
 0x261   : > { %v4208_v41 = vpop.eup %3318  ;;  %3342 = vtanh.f32 %v2187_v17  ;;  %v2188_v42 = vadd.f32 %v2172_v33, %v1300_v30  ;;  %v2025_v31 = vadd.f32 1.0, %v3317_v37  ;;  %3051 = vmatmul.mubr.bf16.gmra.mxu1 %v1383_v36  ;;  %v1374_v60 = vmax.f32 %v1231_v45, 0.0  ;;  %v4219_v63 = vpop.f32.mrf.mxu0 }
 0x262   : > { %v3321_v46 = vpop.eup %3320  ;;  %3344 = vpow2.f32 %v2701_v21  ;;  %v1234_v48 = vpop.f32.mrf.mxu1  ;;  %v1233_v44 = vadd.f32 %v1232_v40, %v4118_v26  ;;  %v2219_v36 = vsub.f32 1.0, %v4201_v28  ;;  %v1316_v39 = vadd.f32 %v4151_v50, %v4161_v8 }
 0x263   : > { %v3323_v49 = vpop.eup %3322  ;;  %3346 = vtanh.f32 %v2188_v42  ;;  %v1235_v55 = vadd.f32 %v1234_v48, %v4115_v25  ;;  %v2121_v22 = vadd.f32 1.0, %v3321_v46  ;;  %v1347_v23 = vpop.f32.mrf.mxu0  ;;  %v2220_v42 = vsub.f32 1.0, %v4208_v41 }
 0x264   : > { %v4213_v52 = vpop.eup %3324  ;;  %v2173_v54 = vmul.f32 %v3323_v49, %v4167_v16  ;;  %3348 = vrcp.f32 %v2025_v31  ;;  %v1236_v57 = vpop.f32.mrf.mxu1  ;;  %v2688_v27 = vmul.f32 -1.442695, %v1233_v44  ;;  %v2703_v50 = vmul.f32 -1.442695, %v1338_v6 }
 0x265   : > { %v3327_v58 = vpop.eup %3326  ;;  %3350 = vrcp.f32 %v2120_v38  ;;  %v1375_v4 = vmax.f32 %v1235_v55, 0.0  ;;  %v1237_v34 = vadd.f32 %v1236_v57, %v4118_v26  ;;  %v4241_v31 = vpop.f32.mrf.mxu0  ;;  %v1344_v48 = vadd.f32 %v4211_v2, %v4112_v24 }
 0x266   : > { %v3329_v0 = vpop.eup %3328  ;;  %v2189_v1 = vadd.f32 %v2173_v54, %v1306_v53  ;;  %3352 = vpow2.f32 %v2686_v47  ;;  %v1240_v19 = vpop.f32.mrf.mxu1  ;;  %v2233_v18 = vmul.f32 %v3327_v58, %v2217_v7  ;;  %v1320_v44 = vadd.f32 %v4157_v3, %v4161_v8 }
 0x267   : > { %v3331_v13 = vpop.eup %3330  ;;  %v2026_v10 = vadd.f32 1.0, %v3329_v0  ;;  %3354 = vpow2.f32 %v2702_v51  ;;  %v1384_v15 = vpack.c.bf16 %v1375_v4, %v1374_v60  ;;  %v1241_v37 = vadd.f32 %v1240_v19, %v4115_v25 }
 0x268   : > { %v3333_v11 = vpop.eup %3332  ;;  %3356 = vtanh.f32 %v2189_v1  ;;  %v2174_v14 = vmul.f32 %v3331_v13, %v4167_v16  ;;  %v1242_v17 = vpop.f32.mrf.mxu1  ;;  %v2689_v51 = vmul.f32 -1.442695, %v1237_v34  ;;  %v2704_v7 = vmul.f32 -1.442695, %v1344_v48 }
 0x269   : > { %v3335_v21 = vpop.eup %3334  ;;  %v2234_v20 = vmul.f32 %v3333_v11, %v2218_v9  ;;  %3358 = vrcp.f32 %v2026_v10  ;;  %3054 = vmatprep.mubr.bf16.mxu1 %v1384_v15  ;;  %v1243_v45 = vadd.f32 %v1242_v17, %v4118_v26  ;;  %v1376_v53 = vmax.f32 %v1241_v37, 0.0 }
 0x26a   : > { %v3337_v62 = vpop.eup %3336  ;;  %v2190_v56 = vadd.f32 %v2174_v14, %v1310_v12  ;;  %3360 = vpow2.f32 %v2687_v59  ;;  %v1244_v29 = vpop.f32.mrf.mxu1  ;;  %v2122_v40 = vadd.f32 1.0, %v3335_v21  ;;  %v1348_v9 = vadd.f32 %v1347_v23, %v4112_v24 }
 0x26b   : > { %v2872_v30 = vpack.c.bf16 %v2234_v20, %v2233_v18  ;;  %v2027_v33 = vadd.f32 1.0, %v3337_v62  ;;  %v4231_v38 = vpop.eup %3338  ;;  %v1245_v46 = vadd.f32 %v1244_v29, %v4115_v25  ;;  %v1353_v25 = vpop.f32.mrf.mxu0  ;;  %v2690_v60 = vmul.f32 -1.442695, %v1243_v45 }
 0x26c   : > { %3362 = vtanh.f32 %v2190_v56  ;;  %v1246_v4 = vpop.f32.mrf.mxu1  ;;  %v1354_v14 = vadd.f32 %v1353_v25, %v4112_v24  ;;  %v1326_v18 = vadd.f32 %v4170_v32, %v4161_v8  ;;  %v2705_v62 = vmul.f32 -1.442695, %v1348_v9 }
 0x26d   : > { %v3341_v5 = vpop.eup %3340  ;;  %2873 = vst [vmem:[%s4237_s30] sm:$0xff] %v2872_v30   ;;  %3364 = vrcp.f32 %v2121_v22  ;;  %v1377_v41 = vmax.f32 %v1245_v46, 0.0  ;;  %v1247_v17 = vadd.f32 %v1246_v4, %v4118_v26  ;;  %v2221_v22 = vsub.f32 1.0, %v4213_v52  ;;  %v4262_v29 = vpop.f32.mrf.mxu0  ;;  %v3271_v4 = vld [vmem:[#allocation10 + $0x10] sm:$0xff]  }
 0x26e   : > { %v3343_v28 = vpop.eup %3342  ;;  %v2175_v47 = vmul.f32 %v3341_v5, %v4167_v16  ;;  %3366 = vrcp.f32 %v2027_v33  ;;  %v2222_v56 = vsub.f32 1.0, %v4231_v38  ;;  %v1330_v38 = vadd.f32 %v4178_v43, %v4161_v8  ;;  %3068 = vmatprep.subr.bf16.mxu1 %v3271_v4 }
 0x26f   : > { %v3345_v49 = vpop.eup %3344  ;;  %3368 = vpow2.f32 %v2688_v27  ;;  %v2235_v58 = vmul.f32 %v3343_v28, %v2219_v36  ;;  %v1385_v0 = vpack.c.bf16 %v1377_v41, %v1376_v53  ;;  %v2706_v27 = vmul.f32 -1.442695, %v1354_v14  ;;  %v1357_v5 = vpop.f32.mrf.mxu0  ;;  %3069 = vmatpush3.bf16.msra.mxu1 %v3271_v4 }
 0x270   : > { %v3347_v54 = vpop.eup %3346  ;;  %v2191_v55 = vadd.f32 %v2175_v47, %v1316_v39  ;;  %3370 = vrcp.f32 %v2122_v40  ;;  %v2123_v3 = vadd.f32 1.0, %v3345_v49  ;;  %v2691_v30 = vmul.f32 -1.442695, %v1247_v17 }
 0x271   : > { %v3349_v57 = vpop.eup %3348  ;;  %v2236_v59 = vmul.f32 %v3347_v54, %v2220_v42  ;;  %3372 = vpow2.f32 %v2703_v50  ;;  %3055 = vmatmul.mubr.bf16.gmra.mxu1 %v1385_v0  ;;  %v1358_v47 = vadd.f32 %v1357_v5, %v4112_v24  ;;  %v1336_v24 = vadd.f32 %v4184_v61, %v4161_v8 }
 0x272   : > { %v4248_v1 = vpop.eup %3350  ;;  %v2176_v2 = vmul.f32 %v3349_v57, %v4167_v16  ;;  %3374 = vpow2.f32 %v2689_v51  ;;  %v1340_v9 = vadd.f32 %v4198_v35, %v4161_v8  ;;  %v1346_v35 = vadd.f32 %v4219_v63, %v4161_v8 }
 0x273   : > { %v3353_v19 = vpop.eup %3352  ;;  %v2877_v13 = vpack.c.bf16 %v2236_v59, %v2235_v58  ;;  %3376 = vtanh.f32 %v2191_v55  ;;  %v2223_v43 = vsub.f32 1.0, %v4248_v1  ;;  %v2707_v57 = vmul.f32 -1.442695, %v1358_v47  ;;  %v1359_v47 = vpop.f32.mrf.mxu0 }
 0x274   : > { %v3355_v10 = vpop.eup %3354  ;;  %v2192_v11 = vadd.f32 %v2176_v2, %v1320_v44  ;;  %v2028_v12 = vadd.f32 1.0, %v3353_v19  ;;  %3378 = vpow2.f32 %v2690_v60 }
 0x275   : > { %v3357_v15 = vpop.eup %3356  ;;  %2923 = vst [vmem:[%s4237_s30 + $0x8] sm:$0xff] %v2877_v13   ;;  %v2124_v41 = vadd.f32 1.0, %v3355_v10 }
 0x276   : > { %v3359_v21 = vpop.eup %3358  ;;  %3380 = vtanh.f32 %v2192_v11  ;;  %v2237_v32 = vmul.f32 %v3357_v15, %v2221_v22  ;;  %v3273_v22 = vld [vmem:[#allocation10] sm:$0xff]  }
 0x277   : > { %v3361_v20 = vpop.eup %3360  ;;  %v2177_v23 = vmul.f32 %v3359_v21, %v4167_v16  ;;  %3382 = vrcp.f32 %v2028_v12 }
 0x278   : > { %v2029_v6 = vadd.f32 1.0, %v3361_v20  ;;  %3384 = vpow2.f32 %v2704_v7  ;;  %v3272_v20 = vld [vmem:[#allocation10 + $0x8] sm:$0xff]  }
 0x279   : > { %v3363_v26 = vpop.eup %3362  ;;  %3386 = vrcp.f32 %v2123_v3  ;;  %v2193_v37 = vadd.f32 %v2177_v23, %v1326_v18  ;;  %3070 = vmatprep.subr.bf16.mxu1 %v3272_v20 }
 0x27a   : > { %v3365_v33 = vpop.eup %3364  ;;  %v2238_v34 = vmul.f32 %v3363_v26, %v2222_v56  ;;  %3388 = vrcp.f32 %v2029_v6  ;;  %3071 = vmatpush3.bf16.msra.mxu1 %v3272_v20 }
 0x27b   : > { %v3367_v52 = vpop.eup %3366  ;;  %3390 = vpow2.f32 %v2705_v62  ;;  %v2224_v53 = vsub.f32 1.0, %v3365_v33  ;;  %3072 = vmatprep.subr.bf16.mxu1 %v3273_v22 }
 0x27c   : > { %v3369_v36 = vpop.eup %3368  ;;  %v2882_v39 = vpack.c.bf16 %v2238_v34, %v2237_v32  ;;  %v2178_v40 = vmul.f32 %v3367_v52, %v4167_v16  ;;  %3392 = vpow2.f32 %v2706_v27  ;;  %v1350_v34 = vadd.f32 %v4241_v31, %v4161_v8 }
 0x27d   : > { %v3371_v42 = vpop.eup %3370  ;;  %v2030_v45 = vadd.f32 1.0, %v3369_v36  ;;  %3394 = vpow2.f32 %v2691_v30 }
 0x27e   : > { %2924 = vst [vmem:[%s4237_s30 + $0x10] sm:$0xff] %v2882_v39   ;;  %3396 = vtanh.f32 %v2193_v37  ;;  %v2194_v46 = vadd.f32 %v2178_v40, %v1330_v38  ;;  %v3373_v28 = vpop.eup %3372  ;;  %v2225_v17 = vsub.f32 1.0, %v3371_v42  ;;  %v1356_v39 = vadd.f32 %v4262_v29, %v4161_v8  ;;  %3073 = vmatpush3.bf16.msra.mxu1 %v3273_v22 }
 0x27f   : > { %3398 = vrcp.f32 %v2030_v45  ;;  %v3375_v50 = vpop.eup %3374  ;;  %v2125_v60 = vadd.f32 1.0, %v3373_v28  ;;  %v1360_v29 = vadd.f32 %v1359_v47, %v4161_v8 }
 0x280   : > { %3400 = vtanh.f32 %v2194_v46  ;;  %v3377_v48 = vpop.eup %3376  ;;  %v2031_v49 = vadd.f32 1.0, %v3375_v50 }
 0x281   : > { %v3379_v51 = vpop.eup %3378  ;;  %v2239_v59 = vmul.f32 %v3377_v48, %v2223_v43 }
 0x282   : > { %3402 = vrcp.f32 %v2031_v49  ;;  %v2032_v55 = vadd.f32 1.0, %v3379_v51 }
 0x283   : > { %v3381_v54 = vpop.eup %3380 }
 0x284   : > { %v3383_v58 = vpop.eup %3382  ;;  %v2240_v25 = vmul.f32 %v3381_v54, %v2224_v53  ;;  %3404 = vrcp.f32 %v2032_v55 }
 0x285   : > { %v3385_v0 = vpop.eup %3384  ;;  %v2179_v44 = vmul.f32 %v3383_v58, %v4167_v16  ;;  %3406 = vrcp.f32 %v2124_v41 }
 0x286   : > { %v3387_v2 = vpop.eup %3386  ;;  %v2887_v1 = vpack.c.bf16 %v2240_v25, %v2239_v59  ;;  %3408 = vpow2.f32 %v2707_v57  ;;  %v2126_v18 = vadd.f32 1.0, %v3385_v0 }
 0x287   : > { %v3389_v19 = vpop.eup %3388  ;;  %v2195_v13 = vadd.f32 %v2179_v44, %v1336_v24  ;;  %3410 = vrcp.f32 %v2125_v60  ;;  %v2226_v21 = vsub.f32 1.0, %v3387_v2 }
 0x288   : > { %v3391_v7 = vpop.eup %3390  ;;  %2925 = vst [vmem:[%s4237_s30 + $0x18] sm:$0xff] %v2887_v1   ;;  %v2180_v10 = vmul.f32 %v3389_v19, %v4167_v16 }
 0x289   : > { %v3393_v61 = vpop.eup %3392  ;;  %3412 = vtanh.f32 %v2195_v13  ;;  %v2127_v56 = vadd.f32 1.0, %v3391_v7 }
 0x28a   : > { %v3395_v11 = vpop.eup %3394  ;;  %v2196_v12 = vadd.f32 %v2180_v10, %v1340_v9  ;;  %v2128_v26 = vadd.f32 1.0, %v3393_v61  ;;  %v2642_v61 = vld [vmem:[%s4540_s6] ss:$0 sm:$0xff] }
 0x28b   : > { %v3397_v14 = vpop.eup %3396  ;;  %v2033_v15 = vadd.f32 1.0, %v3395_v11 }
 0x28c   : > { %v3399_v3 = vpop.eup %3398  ;;  %3414 = vtanh.f32 %v2196_v12  ;;  %v2241_v6 = vmul.f32 %v3397_v14, %v2225_v17 }
 0x28d   : > { %v3401_v23 = vpop.eup %3400  ;;  %v2181_v62 = vmul.f32 %v3399_v3, %v4167_v16  ;;  %3416 = vrcp.f32 %v2033_v15 }
 0x28e   : > { %v2242_v27 = vmul.f32 %v3401_v23, %v2226_v21  ;;  %3418 = vrcp.f32 %v2126_v18 }
 0x28f   : > { %v2197_v30 = vadd.f32 %v2181_v62, %v1346_v35  ;;  %v3403_v33 = vpop.eup %3402  ;;  %3420 = vrcp.f32 %v2127_v56 }
 0x290   : > { %v2892_v32 = vpack.c.bf16 %v2242_v27, %v2241_v6  ;;  %v2182_v63 = vmul.f32 %v3403_v33, %v4167_v16  ;;  %3422 = vrcp.f32 %v2128_v26 }
 0x291   : > { %v3405_v37 = vpop.eup %3404  ;;  %3424 = vtanh.f32 %v2197_v30 }
 0x292   : > { %2926 = vst [vmem:[%s4237_s30 + $0x20] sm:$0xff] %v2892_v32   ;;  %v3407_v52 = vpop.eup %3406  ;;  %v2198_v36 = vadd.f32 %v2182_v63, %v1350_v34  ;;  %v2183_v38 = vmul.f32 %v3405_v37, %v4167_v16 }
 0x293   : > { %v3409_v40 = vpop.eup %3408  ;;  %v2227_v46 = vsub.f32 1.0, %v3407_v52 }
 0x294   : > { %v3411_v5 = vpop.eup %3410  ;;  %3426 = vtanh.f32 %v2198_v36  ;;  %v2199_v42 = vadd.f32 %v2183_v38, %v1356_v39  ;;  %v2129_v31 = vadd.f32 1.0, %v3409_v40 }
 0x295   : > { %v2228_v28 = vsub.f32 1.0, %v3411_v5 }
 0x296   : > { %v3413_v45 = vpop.eup %3412  ;;  %3428 = vtanh.f32 %v2199_v42 }
 0x297   : > { %v2243_v49 = vmul.f32 %v3413_v45, %v2227_v46  ;;  %3430 = vrcp.f32 %v2129_v31 }
 0x299   : > { %v3415_v50 = vpop.eup %3414 }
 0x29a   : > { %v3417_v48 = vpop.eup %3416  ;;  %v2244_v51 = vmul.f32 %v3415_v50, %v2228_v28 }
 0x29b   : > { %v2184_v43 = vmul.f32 %v3417_v48, %v4167_v16  ;;  %v3419_v41 = vpop.eup %3418 }
 0x29c   : > { %v2897_v53 = vpack.c.bf16 %v2244_v51, %v2243_v49  ;;  %v3421_v55 = vpop.eup %3420  ;;  %v2229_v59 = vsub.f32 1.0, %v3419_v41 }
 0x29d   : > { %v2200_v54 = vadd.f32 %v2184_v43, %v1360_v29  ;;  %v3423_v57 = vpop.eup %3422  ;;  %v2230_v25 = vsub.f32 1.0, %v3421_v55 }
 0x29e   : > { %2927 = vst [vmem:[%s4237_s30 + $0x28] sm:$0xff] %v2897_v53   ;;  %v3425_v58 = vpop.eup %3424  ;;  %v2231_v44 = vsub.f32 1.0, %v3423_v57 }
 0x29f   : > { %3432 = vtanh.f32 %v2200_v54  ;;  %v2245_v0 = vmul.f32 %v3425_v58, %v2229_v59 }
 0x2a1   : > { %v3427_v60 = vpop.eup %3426 }
 0x2a2   : > { %v2246_v24 = vmul.f32 %v3427_v60, %v2230_v25 }
 0x2a3   : > { %v3429_v2 = vpop.eup %3428 }
 0x2a4   : > { %v2902_v8 = vpack.c.bf16 %v2246_v24, %v2245_v0  ;;  %v2247_v1 = vmul.f32 %v3429_v2, %v2231_v44  ;;  %v3431_v16 = vpop.eup %3430 }
 0x2a5   : > { %v2232_v4 = vsub.f32 1.0, %v3431_v16 }
 0x2a6   : > { %2928 = vst [vmem:[%s4237_s30 + $0x30] sm:$0xff] %v2902_v8   ;;  %v2651_v8 = vld [vmem:[%s4542_s8] ss:$0 sm:$0xff] }
 0x2ac   : > { %v3433_v19 = vpop.eup %3432 }
 0x2ad   : > { %v2248_v13 = vmul.f32 %v3433_v19, %v2232_v4 }
 0x2af   : > { %v2907_v7 = vpack.c.bf16 %v2248_v13, %v2247_v1 }
 0x2b1   : > { %2929 = vst [vmem:[%s4237_s30 + $0x38] sm:$0xff] %v2907_v7   ;;  %s3636_s30 = scalar_lea.vmem %s3635_s15, 2048 }
 0x2b2   : > { %p3638_p0 = scmp.lt.s32.totalorder %s3636_s30, %s3630_s18 }
 0x2b4   : > { %p3639_p11 = por %p3638_p0, %p3637_p13 }
 0x2b6   : > { %p3640_p5 = pnand %p3639_p11, %p3633_p1 }
 0x301   : > { %v3044_v9 = vpop.f32.mrf.mxu1 }
 0x302   : > { %v1500_v15 = vadd.f32 %v3044_v9, %v2642_v61 }
 0x303   : > { %v1491_v10 = vpop.f32.mrf.mxu1 }
 0x304   : > { %v1492_v12 = vadd.f32 %v2642_v61, %v1491_v10  ;;  %v1556_v22 = vmax.f32 %v1500_v15, 0.0 }
 0x305   : > { %v3045_v11 = vpop.f32.mrf.mxu1 }
 0x306   : > { %v1503_v14 = vadd.f32 %v3045_v11, %v2642_v61  ;;  %v1554_v18 = vmax.f32 %v1492_v12, 0.0 }
 0x307   : > { %v1494_v3 = vpop.f32.mrf.mxu1 }
 0x308   : > { %v1495_v17 = vadd.f32 %v2642_v61, %v1494_v3  ;;  %v1557_v21 = vmax.f32 %v1503_v14, 0.0 }
 0x30a   : > { %v1555_v20 = vmax.f32 %v1495_v17, 0.0  ;;  %v1571_v35 = vpack.c.bf16 %v1557_v21, %v1556_v22 }
 0x30c   : > { %v1570_v23 = vpack.c.bf16 %v1555_v20, %v1554_v18 }
 0x30e   : > { %3074 = vmatprep.mubr.bf16.mxu1 %v1570_v23 }
 0x30f   : > { %3075 = vmatmul.mubr.bf16.vlgmr.msra.gmra.mxu1 %v1571_v35 }
 0x311   : > { %v3048_v62 = vpop.f32.mrf.mxu1 }
 0x312   : > { %v1516_v30 = vadd.f32 %v3048_v62, %v2642_v61 }
 0x313   : > { %v1507_v56 = vpop.f32.mrf.mxu1 }
 0x314   : > { %v1508_v27 = vadd.f32 %v2642_v61, %v1507_v56  ;;  %v1560_v52 = vmax.f32 %v1516_v30, 0.0 }
 0x315   : > { %v3049_v6 = vpop.f32.mrf.mxu1 }
 0x316   : > { %v1519_v26 = vadd.f32 %v3049_v6, %v2642_v61  ;;  %v1558_v63 = vmax.f32 %v1508_v27, 0.0 }
 0x317   : > { %v1510_v33 = vpop.f32.mrf.mxu1 }
 0x318   : > { %v1511_v32 = vadd.f32 %v2642_v61, %v1510_v33  ;;  %v1561_v34 = vmax.f32 %v1519_v26, 0.0 }
 0x31a   : > { %v1559_v37 = vmax.f32 %v1511_v32, 0.0  ;;  %v1573_v39 = vpack.c.bf16 %v1561_v34, %v1560_v52 }
 0x31c   : > { %v1572_v36 = vpack.c.bf16 %v1559_v37, %v1558_v63 }
 0x31e   : > { %3078 = vmatprep.mubr.bf16.mxu1 %v1572_v36 }
 0x31f   : > { %3079 = vmatmul.mubr.bf16.gmra.mxu1 %v1573_v39 }
 0x321   : > { %v3052_v38 = vpop.f32.mrf.mxu1 }
 0x322   : > { %v1532_v31 = vadd.f32 %v3052_v38, %v2642_v61 }
 0x323   : > { %v1523_v40 = vpop.f32.mrf.mxu1 }
 0x324   : > { %v1524_v42 = vadd.f32 %v2642_v61, %v1523_v40  ;;  %v1564_v49 = vmax.f32 %v1532_v31, 0.0 }
 0x325   : > { %v3053_v5 = vpop.f32.mrf.mxu1 }
 0x326   : > { %v1535_v45 = vadd.f32 %v3053_v5, %v2642_v61  ;;  %v1562_v50 = vmax.f32 %v1524_v42, 0.0 }
 0x327   : > { %v1526_v46 = vpop.f32.mrf.mxu1 }
 0x328   : > { %v1527_v28 = vadd.f32 %v2642_v61, %v1526_v46  ;;  %v1565_v47 = vmax.f32 %v1535_v45, 0.0 }
 0x32a   : > { %v1563_v48 = vmax.f32 %v1527_v28, 0.0  ;;  %v1575_v29 = vpack.c.bf16 %v1565_v47, %v1564_v49 }
 0x32c   : > { %v1574_v51 = vpack.c.bf16 %v1563_v48, %v1562_v50 }
 0x32e   : > { %3082 = vmatprep.mubr.bf16.mxu1 %v1574_v51 }
 0x32f   : > { %3083 = vmatmul.mubr.bf16.gmra.mxu1 %v1575_v29 }
 0x331   : > { %v3056_v43 = vpop.f32.mrf.mxu1 }
 0x332   : > { %v1548_v57 = vadd.f32 %v3056_v43, %v2642_v61 }
 0x333   : > { %v1539_v53 = vpop.f32.mrf.mxu1 }
 0x334   : > { %v1540_v54 = vadd.f32 %v2642_v61, %v1539_v53  ;;  %v1568_v24 = vmax.f32 %v1548_v57, 0.0 }
 0x335   : > { %v3057_v41 = vpop.f32.mrf.mxu1 }
 0x336   : > { %v1551_v55 = vadd.f32 %v3057_v41, %v2642_v61  ;;  %v1566_v60 = vmax.f32 %v1540_v54, 0.0 }
 0x337   : > { %v1542_v58 = vpop.f32.mrf.mxu1 }
 0x338   : > { %v1543_v59 = vadd.f32 %v2642_v61, %v1542_v58  ;;  %v1569_v25 = vmax.f32 %v1551_v55, 0.0 }
 0x33a   : > { %v1567_v0 = vmax.f32 %v1543_v59, 0.0  ;;  %v1577_v2 = vpack.c.bf16 %v1569_v25, %v1568_v24 }
 0x33c   : > { %v1576_v44 = vpack.c.bf16 %v1567_v0, %v1566_v60 }
 0x33e   : > { %3086 = vmatprep.mubr.bf16.mxu1 %v1576_v44 }
 0x33f   : > { %3087 = vmatmul.mubr.bf16.gmra.mxu1 %v1577_v2 }
 0x3cf   : > { %v3076_v1 = vpop.f32.mrf.mxu1 }
 0x3d0   : > { %v1692_v16 = vadd.f32 %v3076_v1, %v2651_v8 }
 0x3d1   : > { %v1683_v4 = vpop.f32.mrf.mxu1 }
 0x3d2   : > { %v1684_v19 = vadd.f32 %v2651_v8, %v1683_v4  ;;  %1750 = vmax.xlane.f32.xlu1 %v1692_v16 }
 0x3d3   : > { %v3077_v13 = vpop.f32.mrf.mxu1 }
 0x3d4   : > { %v1695_v7 = vadd.f32 %v3077_v13, %v2651_v8  ;;  %1746 = vmax.xlane.f32.xlu0 %v1684_v19 }
 0x3d5   : > { %v1686_v9 = vpop.f32.mrf.mxu1 }
 0x3d6   : > { %v1687_v10 = vadd.f32 %v2651_v8, %v1686_v9  ;;  %1752 = vmax.xlane.f32.xlu1 %v1695_v7 }
 0x3d8   : > { %1748 = vmax.xlane.f32.xlu0 %v1687_v10 }
 0x3df   : > { %v3080_v61 = vpop.f32.mrf.mxu1 }
 0x3e0   : > { %v1708_v11 = vadd.f32 %v3080_v61, %v2651_v8 }
 0x3e1   : > { %v1699_v12 = vpop.f32.mrf.mxu1 }
 0x3e2   : > { %1758 = vmax.xlane.f32.xlu0 %v1708_v11  ;;  %v1700_v15 = vadd.f32 %v2651_v8, %v1699_v12 }
 0x3e3   : > { %v3081_v14 = vpop.f32.mrf.mxu1 }
 0x3e4   : > { %v1711_v3 = vadd.f32 %v3081_v14, %v2651_v8 }
 0x3e5   : > { %v1702_v17 = vpop.f32.mrf.mxu1 }
 0x3e6   : > { %1760 = vmax.xlane.f32.xlu1 %v1711_v3  ;;  %1754 = vmax.xlane.f32.xlu0 %v1700_v15  ;;  %v4298_v21 = vadd.f32 %v2651_v8, %v1702_v17 }
 0x3ea   : > { %1756 = vmax.xlane.f32.xlu1 %v4298_v21 }
 0x3ef   : > { %v3084_v18 = vpop.f32.mrf.mxu1 }
 0x3f0   : > { %v4301_v20 = vadd.f32 %v3084_v18, %v2651_v8 }
 0x3f1   : > { %v1715_v22 = vpop.f32.mrf.mxu1 }
 0x3f2   : > { %1766 = vmax.xlane.f32.xlu0 %v4301_v20  ;;  %v4304_v35 = vadd.f32 %v2651_v8, %v1715_v22 }
 0x3f3   : > { %v3085_v23 = vpop.f32.mrf.mxu1 }
 0x3f4   : > { %v4306_v62 = vadd.f32 %v3085_v23, %v2651_v8 }
 0x3f5   : > { %v1718_v56 = vpop.f32.mrf.mxu1 }
 0x3f6   : > { %1768 = vmax.xlane.f32.xlu1 %v4306_v62  ;;  %1762 = vmax.xlane.f32.xlu0 %v4304_v35  ;;  %v4310_v6 = vadd.f32 %v2651_v8, %v1718_v56 }
 0x3fa   : > { %1764 = vmax.xlane.f32.xlu1 %v4310_v6 }
 0x3ff   : > { %v3088_v27 = vpop.f32.mrf.mxu1 }
 0x400   : > { %v4316_v34 = vadd.f32 %v3088_v27, %v2651_v8 }
 0x401   : > { %v1731_v26 = vpop.f32.mrf.mxu1 }
 0x402   : > { %v4313_v30 = vadd.f32 %v2651_v8, %v1731_v26 }
 0x403   : > { %v3089_v33 = vpop.f32.mrf.mxu1 }
 0x404   : > { %1770 = vmax.xlane.f32.xlu0 %v4313_v30  ;;  %v4322_v37 = vadd.f32 %v3089_v33, %v2651_v8 }
 0x405   : > { %v1734_v32 = vpop.f32.mrf.mxu1 }
 0x406   : > { %v4318_v63 = vadd.f32 %v2651_v8, %v1734_v32 }
 0x408   : > { %1772 = vmax.xlane.f32.xlu1 %v4318_v63  ;;  %1774 = vmax.xlane.f32.xlu0 %v4316_v34 }
 0x40c   : > { %1776 = vmax.xlane.f32.xlu1 %v4322_v37 }
 0x45b   : > { %v1751_v52 = vpop.xlane.xlu1 %1750 }
 0x45c   : > { %v1780_v36 = vsub.f32 %v1692_v16, %v1751_v52 }
 0x45d   : > { %v1747_v39 = vpop.xlane.xlu0 %1746 }
 0x45e   : > { %v1798_v38 = vmul.f32 1.442695, %v1780_v36  ;;  %v1778_v40 = vsub.f32 %v1684_v19, %v1747_v39 }
 0x45f   : > { %v1753_v5 = vpop.xlane.xlu1 %1752 }
 0x460   : > { %3434 = vpow2.f32 %v1798_v38  ;;  %v1794_v42 = vmul.f32 1.442695, %v1778_v40  ;;  %v1781_v45 = vsub.f32 %v1695_v7, %v1753_v5 }
 0x461   : > { %v1749_v31 = vpop.xlane.xlu0 %1748 }
 0x462   : > { %v1800_v46 = vmul.f32 1.442695, %v1781_v45  ;;  %v1779_v28 = vsub.f32 %v1687_v10, %v1749_v31  ;;  %3436 = vpow2.f32 %v1794_v42 }
 0x464   : > { %3438 = vpow2.f32 %v1800_v46  ;;  %v1796_v47 = vmul.f32 1.442695, %v1779_v28 }
 0x466   : > { %3440 = vpow2.f32 %v1796_v47 }
 0x46b   : > { %v1759_v50 = vpop.xlane.xlu0 %1758 }
 0x46c   : > { %v1784_v48 = vsub.f32 %v1708_v11, %v1759_v50 }
 0x46d   : > { %v4325_v49 = vpop.eup %3434 }
 0x46e   : > { %v1806_v51 = vmul.f32 1.442695, %v1784_v48  ;;  %1830 = vadd.xlane.f32.xlu0 %v4325_v49 }
 0x46f   : > { %v1761_v29 = vpop.xlane.xlu1 %1760  ;;  %v1755_v43 = vpop.xlane.xlu0 %1754 }
 0x470   : > { %v4328_v53 = vpop.eup %3436  ;;  %3442 = vpow2.f32 %v1806_v51  ;;  %v1785_v41 = vsub.f32 %v1711_v3, %v1761_v29  ;;  %v1782_v54 = vsub.f32 %v1700_v15, %v1755_v43 }
 0x471   : > { %v4330_v55 = vpop.eup %3438 }
 0x472   : > { %v1808_v57 = vmul.f32 1.442695, %v1785_v41  ;;  %v1802_v58 = vmul.f32 1.442695, %v1782_v54  ;;  %1832 = vadd.xlane.f32.xlu1 %v4330_v55  ;;  %1826 = vadd.xlane.f32.xlu0 %v4328_v53 }
 0x473   : > { %v1757_v59 = vpop.xlane.xlu1 %1756  ;;  %v4335_v60 = vpop.eup %3440 }
 0x474   : > { %3444 = vpow2.f32 %v1808_v57  ;;  %v1783_v25 = vsub.f32 %v4298_v21, %v1757_v59 }
 0x475   : > { %3446 = vpow2.f32 %v1802_v58 }
 0x476   : > { %v1804_v0 = vmul.f32 1.442695, %v1783_v25  ;;  %1828 = vadd.xlane.f32.xlu1 %v4335_v60 }
 0x478   : > { %3448 = vpow2.f32 %v1804_v0 }
 0x47b   : > { %v1767_v24 = vpop.xlane.xlu0 %1766 }
 0x47c   : > { %v1788_v2 = vsub.f32 %v4301_v20, %v1767_v24 }
 0x47d   : > { %v4338_v44 = vpop.eup %3442 }
 0x47e   : > { %1838 = vadd.xlane.f32.xlu0 %v4338_v44  ;;  %v1814_v8 = vmul.f32 1.442695, %v1788_v2 }
 0x47f   : > { %v1769_v1 = vpop.xlane.xlu1 %1768  ;;  %v1763_v16 = vpop.xlane.xlu0 %1762 }
 0x480   : > { %3450 = vpow2.f32 %v1814_v8  ;;  %v1789_v19 = vsub.f32 %v4306_v62, %v1769_v1  ;;  %v1786_v13 = vsub.f32 %v4304_v35, %v1763_v16 }
 0x481   : > { %v4342_v4 = vpop.eup %3444 }
 0x482   : > { %v4346_v7 = vpop.eup %3446  ;;  %1840 = vadd.xlane.f32.xlu1 %v4342_v4  ;;  %v1816_v9 = vmul.f32 1.442695, %v1789_v19  ;;  %v1810_v10 = vmul.f32 1.442695, %v1786_v13 }
 0x483   : > { %1834 = vadd.xlane.f32.xlu0 %v4346_v7  ;;  %v1765_v61 = vpop.xlane.xlu1 %1764 }
 0x484   : > { %3452 = vpow2.f32 %v1816_v9  ;;  %v1787_v12 = vsub.f32 %v4310_v6, %v1765_v61 }
 0x485   : > { %v4350_v11 = vpop.eup %3448  ;;  %3454 = vpow2.f32 %v1810_v10 }
 0x486   : > { %1836 = vadd.xlane.f32.xlu1 %v4350_v11  ;;  %v1812_v14 = vmul.f32 1.442695, %v1787_v12 }
 0x488   : > { %3456 = vpow2.f32 %v1812_v14 }
 0x48d   : > { %v4354_v15 = vpop.eup %3450  ;;  %v1771_v3 = vpop.xlane.xlu0 %1770 }
 0x48e   : > { %1846 = vadd.xlane.f32.xlu0 %v4354_v15  ;;  %v1790_v17 = vsub.f32 %v4313_v30, %v1771_v3 }
 0x490   : > { %v1818_v18 = vmul.f32 1.442695, %v1790_v17 }
 0x491   : > { %v4358_v21 = vpop.eup %3452  ;;  %v1773_v22 = vpop.xlane.xlu1 %1772 }
 0x492   : > { %v4360_v20 = vpop.eup %3454  ;;  %v1775_v23 = vpop.xlane.xlu0 %1774  ;;  %1848 = vadd.xlane.f32.xlu1 %v4358_v21  ;;  %3458 = vpow2.f32 %v1818_v18  ;;  %v1791_v35 = vsub.f32 %v4318_v63, %v1773_v22 }
 0x493   : > { %v1792_v62 = vsub.f32 %v4316_v34, %v1775_v23  ;;  %1842 = vadd.xlane.f32.xlu0 %v4360_v20 }
 0x494   : > { %v1820_v6 = vmul.f32 1.442695, %v1791_v35 }
 0x495   : > { %v4366_v56 = vpop.eup %3456  ;;  %v1822_v27 = vmul.f32 1.442695, %v1792_v62  ;;  %v1777_v26 = vpop.xlane.xlu1 %1776 }
 0x496   : > { %1844 = vadd.xlane.f32.xlu1 %v4366_v56  ;;  %3460 = vpow2.f32 %v1820_v6  ;;  %v1793_v30 = vsub.f32 %v4322_v37, %v1777_v26 }
 0x497   : > { %3462 = vpow2.f32 %v1822_v27 }
 0x498   : > { %v1824_v33 = vmul.f32 1.442695, %v1793_v30 }
 0x49a   : > { %3464 = vpow2.f32 %v1824_v33 }
 0x49f   : > { %v4370_v32 = vpop.eup %3458 }
 0x4a0   : > { %1850 = vadd.xlane.f32.xlu0 %v4370_v32 }
 0x4a3   : > { %v4373_v34 = vpop.eup %3460 }
 0x4a4   : > { %v4375_v63 = vpop.eup %3462  ;;  %1852 = vadd.xlane.f32.xlu1 %v4373_v34 }
 0x4a5   : > { %1854 = vadd.xlane.f32.xlu0 %v4375_v63 }
 0x4a7   : > { %v4379_v52 = vpop.eup %3464 }
 0x4a8   : > { %1856 = vadd.xlane.f32.xlu1 %v4379_v52 }
 0x4a9   : > { %3643 = shalt.err (!%p3640_p5)
}
 0x4aa   : > { %s3644_s1 = scalar_lea.hbm %s4391_s16, 1024  ;;  %s3648_s19 = scalar_lea.hbm %s4545_s11, 2048 }
 0x4ab   : > { %p3645_p6 = scmp.ne.s32.totalorder %s4391_s16, %s3644_s1  ;;  %p3649_p9 = scmp.lt.s32.totalorder %s4391_s16, %s4545_s11 }
 0x4ac   : > { %p3650_p2 = scmp.lt.s32.totalorder %s3648_s19, %s3644_s1 }
 0x4ad   : > { %p3646_p4 = pnand %p3645_p6, %p4583_p12 }
 0x4ae   : > { %p3651_p3 = por %p3650_p2, %p3649_p9 }
 0x4af   : > { %p3647_p8 = pneg %p3646_p4 }
 0x4b1   : > { %p3652_p10 = pnand %p3651_p3, %p3647_p8 }
 0x4b3   : > { %3655 = shalt.err (!%p3652_p10)
}
 0x4b4   : > { %s3771_s18 = smov 64   ;;  %s3772_s15 = smov 4  }
 0x4b5   : > { %3109 = dma.vmem_to_hbm [thread:$0]  (%p4583_p12), %s4396_s28, 1024, %s4391_s16, %s4404_s29, %s3771_s18, %s3771_s18, %s3772_s15  }
 0x4b6   : > { %s3656_s0 = scalar_lea.vmem %s4393_s13, 1024  ;;  %s3773_s30 = smov [#allocation14]  }
 0x4b7   : > { %p3657_p7 = scmp.ne.s32.totalorder %s4393_s13, %s3656_s0  ;;  %s3660_s1 = sshll.u32 %s3773_s30, 4  ;;  %s3661_s1 = int_to_ptr.vmem [resolvable:$false] %s3660_s1 }
 0x4b8   : > { %s3662_s14 = scalar_lea.vmem %s3661_s1, 2048  ;;  %p3663_p0 = scmp.lt.s32.totalorder %s4393_s13, %s3661_s1 }
 0x4b9   : > { %p3658_p1 = pnand %p3657_p7, %p4583_p12  ;;  %p3664_p11 = scmp.lt.s32.totalorder %s3662_s14, %s3656_s0 }
 0x4bb   : > { %p3659_p13 = pneg %p3658_p1  ;;  %p3665_p5 = por %p3664_p11, %p3663_p0 }
 0x4bd   : > { %p3666_p6 = pnand %p3665_p5, %p3659_p13 }
 0x4bf   : > { %3669 = shalt.err (!%p3666_p6)
}
 0x4c0   : > { %s3670_s5 = scalar_lea.hbm %s4402_s25, 1024  ;;  %s3674_s19 = scalar_lea.hbm %s4546_s12, 2048 }
 0x4c1   : > { %p3671_p4 = scmp.ne.s32.totalorder %s4402_s25, %s3670_s5  ;;  %p3675_p2 = scmp.lt.s32.totalorder %s4402_s25, %s4546_s12 }
 0x4c2   : > { %p3676_p3 = scmp.lt.s32.totalorder %s3674_s19, %s3670_s5 }
 0x4c3   : > { %p3672_p8 = pnand %p3671_p4, %p4583_p12 }
 0x4c4   : > { %p3677_p10 = por %p3676_p3, %p3675_p2 }
 0x4c5   : > { %p3673_p9 = pneg %p3672_p8 }
 0x4c7   : > { %p3678_p7 = pnand %p3677_p10, %p3673_p9 }
 0x4c9   : > { %3681 = shalt.err (!%p3678_p7)
}
 0x4ca   : > { %3110 = dma.vmem_to_hbm [thread:$0]  (%p4583_p12), %s4393_s13, 1024, %s4402_s25, %s4404_s29, %s3771_s18, %s3771_s18, %s3772_s15  }
 0x4cb   : > { %s4457_s13 = scalar_lea.vmem [#allocation11], %s4060_s27  ;;  %s4485_s0 = scalar_lea.hbm %s4544_s10, %s4385_s3 }
 0x4cc   : > { %s2353_s27 = sshll.u32 %s4457_s13, 4  ;;  %s2330_s1 = scalar_lea.sflag [#allocation4], %s4000_s7  ;;  %s4487_s27 = int_to_ptr.vmem [resolvable:$true] %s2353_s27 }
 0x4cd   : > { %s3682_s14 = scalar_lea.vmem %s4487_s27, 1024  ;;  %s3774_s5 = smov [#allocation11]  }
 0x4ce   : > { %p3683_p1 = scmp.ne.s32.totalorder %s4487_s27, %s3682_s14  ;;  %s3686_s16 = sshll.u32 %s3774_s5, 4  ;;  %s3687_s16 = int_to_ptr.vmem [resolvable:$false] %s3686_s16 }
 0x4cf   : > { %s3688_s28 = scalar_lea.vmem %s3687_s16, 2048  ;;  %p3689_p11 = scmp.lt.s32.totalorder %s4487_s27, %s3687_s16 }
 0x4d0   : > { %p3684_p13 = pnand %p3683_p1, %p4583_p12  ;;  %p3690_p5 = scmp.lt.s32.totalorder %s3688_s28, %s3682_s14 }
 0x4d2   : > { %p3685_p0 = pneg %p3684_p13  ;;  %p3691_p6 = por %p3690_p5, %p3689_p11 }
 0x4d4   : > { %p3692_p4 = pnand %p3691_p6, %p3685_p0 }
 0x4f7   : > { %v1831_v37 = vpop.xlane.xlu0 %1830 }
 0x4f8   : > { %3466 = vrcp.f32 %v1831_v37 }
 0x4fb   : > { %v1833_v36 = vpop.xlane.xlu1 %1832  ;;  %v1827_v39 = vpop.xlane.xlu0 %1826 }
 0x4fc   : > { %3468 = vrcp.f32 %v1833_v36 }
 0x4fd   : > { %3470 = vrcp.f32 %v1827_v39 }
 0x4ff   : > { %v1829_v38 = vpop.xlane.xlu1 %1828 }
 0x500   : > { %3472 = vrcp.f32 %v1829_v38 }
 0x505   : > { %v3467_v40 = vpop.eup %3466 }
 0x506   : > { %v1863_v45 = vmul.f32 %v3467_v40, %v4325_v49 }
 0x507   : > { %v1839_v5 = vpop.xlane.xlu0 %1838 }
 0x508   : > { %3474 = vrcp.f32 %v1839_v5 }
 0x509   : > { %v3469_v42 = vpop.eup %3468 }
 0x50a   : > { %v1865_v31 = vmul.f32 %v3469_v42, %v4330_v55  ;;  %v3471_v46 = vpop.eup %3470 }
 0x50b   : > { %v1841_v28 = vpop.xlane.xlu1 %1840  ;;  %v1859_v51 = vmul.f32 %v3471_v46, %v4328_v53 }
 0x50c   : > { %v2837_v47 = vpack.c.bf16 %v1865_v31, %v1863_v45  ;;  %3476 = vrcp.f32 %v1841_v28  ;;  %v1835_v50 = vpop.xlane.xlu0 %1834 }
 0x50d   : > { %v3473_v48 = vpop.eup %3472  ;;  %3478 = vrcp.f32 %v1835_v50 }
 0x50e   : > { %2916 = vst [vmem:[%s4457_s13 + $0x8] sm:$0xff] %v2837_v47   ;;  %v1861_v29 = vmul.f32 %v3473_v48, %v4335_v60 }
 0x50f   : > { %v1837_v49 = vpop.xlane.xlu1 %1836 }
 0x510   : > { %v2832_v43 = vpack.c.bf16 %v1861_v29, %v1859_v51  ;;  %3480 = vrcp.f32 %v1837_v49 }
 0x512   : > { %2833 = vst [vmem:[%s4457_s13] sm:$0xff] %v2832_v43  }
 0x515   : > { %v3475_v41 = vpop.eup %3474 }
 0x516   : > { %v1871_v57 = vmul.f32 %v3475_v41, %v4338_v44 }
 0x517   : > { %v1847_v54 = vpop.xlane.xlu0 %1846 }
 0x518   : > { %3482 = vrcp.f32 %v1847_v54 }
 0x519   : > { %v3477_v55 = vpop.eup %3476 }
 0x51a   : > { %v1873_v58 = vmul.f32 %v3477_v55, %v4342_v4  ;;  %v3479_v59 = vpop.eup %3478 }
 0x51b   : > { %v1849_v53 = vpop.xlane.xlu1 %1848  ;;  %v1867_v24 = vmul.f32 %v3479_v59, %v4346_v7 }
 0x51c   : > { %v2847_v25 = vpack.c.bf16 %v1873_v58, %v1871_v57  ;;  %3484 = vrcp.f32 %v1849_v53  ;;  %v1843_v60 = vpop.xlane.xlu0 %1842 }
 0x51d   : > { %v3481_v0 = vpop.eup %3480  ;;  %3486 = vrcp.f32 %v1843_v60 }
 0x51e   : > { %2918 = vst [vmem:[%s4457_s13 + $0x18] sm:$0xff] %v2847_v25   ;;  %v1869_v2 = vmul.f32 %v3481_v0, %v4350_v11 }
 0x51f   : > { %v1845_v1 = vpop.xlane.xlu1 %1844 }
 0x520   : > { %v2842_v8 = vpack.c.bf16 %v1869_v2, %v1867_v24  ;;  %3488 = vrcp.f32 %v1845_v1 }
 0x522   : > { %2917 = vst [vmem:[%s4457_s13 + $0x10] sm:$0xff] %v2842_v8  }
 0x525   : > { %v3483_v44 = vpop.eup %3482 }
 0x526   : > { %v1879_v4 = vmul.f32 %v3483_v44, %v4354_v15 }
 0x529   : > { %v3485_v16 = vpop.eup %3484  ;;  %v1851_v13 = vpop.xlane.xlu0 %1850 }
 0x52a   : > { %v1881_v19 = vmul.f32 %v3485_v16, %v4358_v21  ;;  %v3487_v9 = vpop.eup %3486  ;;  %3490 = vrcp.f32 %v1851_v13 }
 0x52b   : > { %v1875_v7 = vmul.f32 %v3487_v9, %v4360_v20 }
 0x52c   : > { %v2857_v10 = vpack.c.bf16 %v1881_v19, %v1879_v4 }
 0x52d   : > { %v3489_v61 = vpop.eup %3488  ;;  %v1853_v12 = vpop.xlane.xlu1 %1852 }
 0x52e   : > { %2920 = vst [vmem:[%s4457_s13 + $0x28] sm:$0xff] %v2857_v10   ;;  %v1877_v11 = vmul.f32 %v3489_v61, %v4366_v56  ;;  %3492 = vrcp.f32 %v1853_v12  ;;  %v1855_v14 = vpop.xlane.xlu0 %1854 }
 0x52f   : > { %3494 = vrcp.f32 %v1855_v14 }
 0x530   : > { %v2852_v3 = vpack.c.bf16 %v1877_v11, %v1875_v7 }
 0x531   : > { %v1857_v15 = vpop.xlane.xlu1 %1856 }
 0x532   : > { %2919 = vst [vmem:[%s4457_s13 + $0x20] sm:$0xff] %v2852_v3   ;;  %3496 = vrcp.f32 %v1857_v15 }
 0x537   : > { %v3491_v17 = vpop.eup %3490 }
 0x538   : > { %v1883_v18 = vmul.f32 %v3491_v17, %v4370_v32 }
 0x53b   : > { %v3493_v21 = vpop.eup %3492 }
 0x53c   : > { %v1885_v20 = vmul.f32 %v3493_v21, %v4373_v34  ;;  %v3495_v22 = vpop.eup %3494 }
 0x53d   : > { %v1887_v62 = vmul.f32 %v3495_v22, %v4375_v63 }
 0x53e   : > { %v2862_v23 = vpack.c.bf16 %v1885_v20, %v1883_v18 }
 0x53f   : > { %v3497_v35 = vpop.eup %3496 }
 0x540   : > { %2921 = vst [vmem:[%s4457_s13 + $0x30] sm:$0xff] %v2862_v23   ;;  %v1889_v56 = vmul.f32 %v3497_v35, %v4379_v52 }
 0x542   : > { %v2867_v6 = vpack.c.bf16 %v1889_v56, %v1887_v62 }
 0x544   : > { %2922 = vst [vmem:[%s4457_s13 + $0x38] sm:$0xff] %v2867_v6  }
 0x545   : > { %3695 = shalt.err (!%p3692_p4)
}
 0x546   : > { %s3696_s3 = scalar_lea.hbm %s4485_s0, 1024  ;;  %s3700_s26 = scalar_lea.hbm %s4544_s10, 2048 }
 0x547   : > { %p3697_p8 = scmp.ne.s32.totalorder %s4485_s0, %s3696_s3  ;;  %p3701_p3 = scmp.lt.s32.totalorder %s4485_s0, %s4544_s10 }
 0x548   : > { %p3702_p10 = scmp.lt.s32.totalorder %s3700_s26, %s3696_s3 }
 0x549   : > { %p3698_p9 = pnand %p3697_p8, %p4583_p12 }
 0x54a   : > { %p3703_p7 = por %p3702_p10, %p3701_p3 }
 0x54b   : > { %p3699_p2 = pneg %p3698_p9 }
 0x54d   : > { %p3704_p1 = pnand %p3703_p7, %p3699_p2 }
 0x54f   : > { %3707 = shalt.err (!%p3704_p1)
}
 0x550   : > { %3108 = dma.vmem_to_hbm [thread:$0]  (%p4583_p12), %s4487_s27, 1024, %s4485_s0, %s2330_s1, %s3771_s18, %s3771_s18, %s3772_s15  }
 0x551 PF: > { %s4584_s25 = sld [smem:[#allocation20_spill]]  ;;  %s2400_s29 = sand.u32 1, %s3746_s21  }
 0x552   : > { %p4586_p0 = scmp.ge.s32.totalorder %s3758_s24, 2  ;;  %s2401_s14 = scalar_lea.sflag [#allocation4], %s2400_s29 }
 0x557   : > { %p4585_p13 = scmp.ne.s32.totalorder %s4584_s25, 0 }
 0x559   : > { %p3132_p11 = pnand %p4586_p0, %p4585_p13 }
 0x55b   : > { %p3133_p5 = pneg %p3132_p11 }
 0x55d   : > { %3737 = dma.done.wait (%p3133_p5), %s2401_s14, 1024  }
 0x55e   : > { %3739 = vsyncadd (%p3133_p5), %s2401_s14, 4294966272  ;;  %s4587_s17 = sadd.s32 4294967294, %s3758_s24  }
 0x55f   : > { %s2409_s5 = sand.u32 1, %s4587_s17  }
 0x560   : > { %s2410_s16 = scalar_lea.sflag [#allocation13], %s2409_s5 }
 0x561   : > { %3741 = dma.done.wait (%p3133_p5), %s2410_s16, 2048  }
 0x562   : > { %3743 = vsyncadd (%p3133_p5), %s2410_s16, 4294965248  ;;  %s4588_s18 = sld [smem:[#allocation21_spill]]  ;;  %p31_p12 = scmp.ge.s32.totalorder %s3942_s20, 4  }
 0x563   : > { %s4589_s21 = smov %s3750_s22  ;;  %s4590_s22 = smov %s3754_s23 }
 0x564   : > { %s4592_s24 = smov %s3942_s20  ;;  %33 = sbr.rel (!%p31_p12) target bundleno = 15 (0xf), region = 153 }
 0x568   : > { %s4591_s23 = smov %s4588_s18 }
 0x569   :  { %2424 = vsyncpa [#allocation3], 1 }
 0x56a   :  { %2426 = vsyncpa [#allocation3 + $0x1], 1 }
 0x56b   :  { %2427 = vsyncpa [#allocation6], 1 }
 0x56c   :  { %2428 = vsyncpa [#allocation9], 1 }
 0x56d   :  { %2429 = vsyncpa [#allocation4], 1 }
 0x56e   :  { %2431 = vsyncpa [#allocation4 + $0x1], 1 }
 0x56f   :  { %2432 = vsyncpa [#allocation13], 1 }
 0x570   :  { %2434 = vsyncpa [#allocation13 + $0x1], 1 }

</bundles_post_ra>
